<compile_context>
chip_gen: v6e
topology: v6e:2x2x1
jax: 0.10.0
libtpu: 0.0.40
codegen_flags: <defaults>
</compile_context>

<pallas_src>
import functools

import numpy as np

import jax
import jax.numpy as jnp
from jax.experimental import pallas as pl
from jax.experimental.pallas import tpu as pltpu


def _vmem():
    # Whole-array block resident in VMEM (all operands are KB-scale).
    return pl.BlockSpec(memory_space=pltpu.MemorySpace.VMEM)


# ---------------------------------------------------------------------------
# Fused forward kernel
# ---------------------------------------------------------------------------
def fused_net_kernel(p1_ref, w1bd_ref, b1t_ref, w2b_ref, b2t_ref,
                     wf1_ref, bf1_ref, wf2_ref, bf2_ref, o_ref, *, n):
    """Single-kernel forward. All intermediates stay in VMEM/vregs.

    p1_ref : (4*n*16, 400) bf16  conv1 im2col patches, pool-offset-major rows
                                 (a,b,n,I); cols (J, kh*5+kw) on a 16-wide
                                 zero-padded pooled grid (valid I,J <= 11).
    w1bd_ref: (400, 160)   bf16  block-diagonal conv1 weight, cols (J, cout).
    b1t_ref : (1, 160)     f32   conv1 bias tiled over J.
    w2b_ref : (5, 160, 256) bf16 banded conv2 weights per kh; rows (J, cin),
                                 cols (parity*128 + t*20 + cout), lanes 80..127
                                 of each parity block are zero padding.
    b2t_ref : (1, 128)     f32   conv2 bias tiled over t (zeros in pad lanes).
    wf1_ref : (512, 50)    bf16  fc1 weight permuted to (s, t*20+cout) flatten
                                 order, zero rows at the pad lanes.
    bf1_ref : (1, 50)      f32
    wf2_ref : (50, 10)     bf16
    bf2_ref : (1, 10)      f32
    o_ref   : (n, 10)      f32   log_softmax output.
    """
    m1 = n * 16

    # ---- conv1 (pooled column J folded into output lanes) + 2x2 pool + bias
    # + ReLU: one MXU pass, pool = max over the 4 pool-offset row groups
    # (per-channel bias commutes with the max).
    c1 = jnp.dot(p1_ref[...], w1bd_ref[...], preferred_element_type=jnp.float32)
    c1 = c1.reshape(4, m1, 160)                       # (pool offset, (n,I), (J,c))
    y1 = jnp.maximum(jnp.max(c1, axis=0) + b1t_ref[...], 0.0)      # (m1, 160) f32
    # NOTE: padded positions (I >= 12 or J >= 12) hold relu(b1) garbage; they
    # are only safe because the kh slices below stop at I = 11 and the banded
    # conv2 weights have exactly-zero rows for J >= 12.  Revisit if the pad or
    # kernel size ever changes.
    y1 = y1.reshape(n, 16, 160).astype(jnp.bfloat16)  # single bf16 cast, hoisted

    # ---- conv2: 5 banded matmuls (only kh is sliced), f32 accumulation.
    acc = jnp.zeros((n * 8, 256), jnp.float32)        # rows (n,i), cols (parity,t,c)
    for kh in range(5):
        slab = y1[:, kh:kh + 8, :].reshape(n * 8, 160)
        acc = acc + jnp.dot(slab, w2b_ref[kh],
                            preferred_element_type=jnp.float32)
    # TODO(synk): on v7x verify in the bundle dump that this chain lowers to
    # in-place MRB accumulation; if it is vmatres-pop + vadd, switch to a
    # single dot_general over a stacked contraction axis.
    # TODO(synk): conv2_drop (Dropout2d) and F.dropout are identity in eval
    # mode; stochastic training-mode dropout is not implemented.

    # ---- 2x2 max-pool + bias + ReLU (128-lane-aligned, lane-dense).
    ce = jnp.maximum(acc[:, 0:128], acc[:, 128:256])  # column pool: parity blocks
    vr = jnp.max(ce.reshape(n, 4, 2, 128), axis=2)    # row pool -> (n, 4, 128)
    y2 = jnp.maximum(vr + b2t_ref[...], 0.0)          # bias per-channel, commutes

    # ---- fc1 -> ReLU -> fc2 -> log_softmax.
    flat = y2.reshape(n, 512).astype(jnp.bfloat16)
    h = jnp.dot(flat, wf1_ref[...], preferred_element_type=jnp.float32)
    h = jnp.maximum(h + bf1_ref[...], 0.0)
    logits = jnp.dot(h.astype(jnp.bfloat16), wf2_ref[...],
                     preferred_element_type=jnp.float32) + bf2_ref[...]
    mx = jnp.max(logits, axis=-1, keepdims=True)
    s = logits - mx
    lse = jnp.log(jnp.sum(jnp.exp(s), axis=-1, keepdims=True))
    o_ref[...] = s - lse


# ---------------------------------------------------------------------------
# One-time parameter re-layouts (hoisted out of the jitted forward; numpy)
# ---------------------------------------------------------------------------
def _conv1_blockdiag_weight(w1):
    """(10,1,5,5) -> (400,160): rows (J, kh*5+kw), cols (J, cout), block-diag in J."""
    w1t = np.transpose(np.asarray(w1).reshape(10, 25))          # (tap, cout)
    wbd = np.zeros((16, 25, 16, 10), np.float32)
    for j in range(16):
        wbd[j, :, j, :] = w1t
    return jnp.asarray(wbd.reshape(400, 160), dtype=jnp.bfloat16)


def _conv2_banded_weights(w2):
    """(20,10,5,5) -> (5,160,256) banded weights embedding the kw shift.

    wk[kh, J*10+cin, parity*128 + t*20 + cout] = w2[cout, cin, kh, J - (2t+parity)]
    for 0 <= J - (2t+parity) <= 4, zero otherwise (incl. pad lanes 80..127).
    """
    w2n = np.asarray(w2)
    wk = np.zeros((5, 160, 256), np.float32)
    for kh in range(5):
        for kw in range(5):
            wt = np.transpose(w2n[:, :, kh, kw])                # (cin, cout)
            for t in range(4):
                for parity in range(2):
                    j = 2 * t + parity
                    jj = j + kw                                 # source column J
                    c0 = parity * 128 + t * 20
                    wk[kh, jj * 10:(jj + 1) * 10, c0:c0 + 20] = wt
    return jnp.asarray(wk, dtype=jnp.bfloat16)


def _fc1_weight_permuted(wf1):
    """(50,320) -> (512,50) matching the kernel flatten order (s, t*20+cout);
    zero rows at the 48 pad lanes of each s-block."""
    w = np.asarray(wf1).reshape(50, 20, 4, 4)       # (o, c, s, t)  [NCHW flatten]
    w = np.transpose(w, (2, 3, 1, 0))               # (s, t, c, o)
    wp = np.zeros((4, 128, 50), np.float32)
    for t in range(4):
        wp[:, t * 20:(t + 1) * 20, :] = w[:, t, :, :]
    return jnp.asarray(wp.reshape(512, 50), dtype=jnp.bfloat16)


def prepare_params(params):
    """One-time kernel-format re-layout of the PyTorch-layout parameters."""
    w1, b1, w2, b2, wf1, bf1, wf2, bf2 = params
    b1t = np.tile(np.asarray(b1, np.float32), 16).reshape(1, 160)
    b2t = np.zeros((1, 128), np.float32)
    b2t[0, :80] = np.tile(np.asarray(b2, np.float32), 4)
    return (
        _conv1_blockdiag_weight(w1),
        jnp.asarray(b1t),
        _conv2_banded_weights(w2),
        jnp.asarray(b2t),
        _fc1_weight_permuted(wf1),
        jnp.asarray(np.asarray(bf1, np.float32).reshape(1, 50)),
        jnp.asarray(np.transpose(np.asarray(wf2, np.float32)), dtype=jnp.bfloat16),
        jnp.asarray(np.asarray(bf2, np.float32).reshape(1, 10)),
    )


# ---------------------------------------------------------------------------
# Host-side x-dependent glue: static-slice im2col (runs inside jit)
# ---------------------------------------------------------------------------
def _conv1_pool_patches(x):
    """conv1 im2col grouped by 2x2-pool offset, built from static slices only.

    x: (N, 1, 28, 28) f32 -> (4*N*16, 400) bf16.
    Rows: pool-offset-major (a, b), then (n, I) on a 16-row zero-padded pooled
    grid (valid I <= 11).  Cols: (J, kh*5+kw) with J on a 16-wide padded grid.
    TODO(synk): for batched operation build these patches in-kernel (or stream
    them with pl.Buffered) to avoid the ~16x HBM read amplification on v5e.
    """
    n = x.shape[0]
    xs = x[:, 0]                                               # (N, 28, 28)
    groups = []
    for a in range(2):
        for b in range(2):
            taps = []
            for kh in range(5):
                for kw in range(5):
                    s = xs[:, a + kh:a + kh + 23:2, b + kw:b + kw + 23:2]  # (N,12,12)
                    taps.append(jnp.pad(s, ((0, 0), (0, 4), (0, 4))))      # (N,16,16)
            t = jnp.stack(taps, axis=-1)                       # (N, I, J, tap)
            groups.append(t.reshape(n * 16, 16 * 25))          # rows (n,I), cols (J,tap)
    return jnp.concatenate(groups, axis=0).astype(jnp.bfloat16)


def net_forward(x, prepped):
    """Forward pass of `Net` (eval mode) as one fused Pallas TPU kernel."""
    w1bd, b1t, w2b, b2t, wf1p, bf1r, wf2t, bf2r = prepped
    n = x.shape[0]

    p1 = _conv1_pool_patches(x)                                # (4n*16, 400)

    kernel = functools.partial(fused_net_kernel, n=n)
    return pl.pallas_call(
        kernel,
        out_shape=jax.ShapeDtypeStruct((n, 10), jnp.float32),
        in_specs=[_vmem()] * 9,
        out_specs=_vmem(),
    )(p1, w1bd, b1t, w2b, b2t, wf1p, bf1r, wf2t, bf2r)


# ---------------------------------------------------------------------------
# Deterministic synthetic parameters (shapes from Net.__init__)
# ---------------------------------------------------------------------------
def init_params(key):
    ks = jax.random.split(key, 8)

    def u(k, shape, fan_in):
        bound = 1.0 / jnp.sqrt(jnp.float32(fan_in))
        return jax.random.uniform(k, shape, jnp.float32, -bound, bound)

    w1 = u(ks[0], (10, 1, 5, 5), 1 * 5 * 5)
    b1 = u(ks[1], (10,), 1 * 5 * 5)
    w2 = u(ks[2], (20, 10, 5, 5), 10 * 5 * 5)
    b2 = u(ks[3], (20,), 10 * 5 * 5)
    wf1 = u(ks[4], (50, 320), 320)
    bf1 = u(ks[5], (50,), 320)
    wf2 = u(ks[6], (10, 50), 50)
    bf2 = u(ks[7], (10,), 50)
    return (w1, b1, w2, b2, wf1, bf1, wf2, bf2)


if __name__ == "__main__":
    key = jax.random.PRNGKey(0)
    pkey, xkey = jax.random.split(key)
    params = init_params(pkey)
    prepped = prepare_params(params)        # one-time re-layout, outside jit

    # fc1's 320 = 20*4*4 forces a 1x28x28 input; keep batch small (N=2).
    x = jax.random.normal(xkey, (2, 1, 28, 28), jnp.float32)

    fwd = jax.jit(net_forward)
    out = jax.block_until_ready(fwd(x, prepped))

    assert out.shape == (2, 10) and out.dtype == jnp.float32
    # log_softmax rows must exponentiate-sum to 1.
    row_sums = jnp.sum(jnp.exp(out), axis=-1)
    assert bool(jnp.all(jnp.abs(row_sums - 1.0) < 1e-3))
    print("KERNEL_OK")
</pallas_src>

<mosaic_0001>
module attributes {stable_mosaic.version = 11 : i64} {
  func.func @fused_net_kernel(%arg0: memref<128x400xbf16, #tpu.memory_space<vmem>>, %arg1: memref<400x160xbf16, #tpu.memory_space<vmem>>, %arg2: memref<1x160xf32, #tpu.memory_space<vmem>>, %arg3: memref<5x160x256xbf16, #tpu.memory_space<vmem>>, %arg4: memref<1x128xf32, #tpu.memory_space<vmem>>, %arg5: memref<512x50xbf16, #tpu.memory_space<vmem>>, %arg6: memref<1x50xf32, #tpu.memory_space<vmem>>, %arg7: memref<50x10xbf16, #tpu.memory_space<vmem>>, %arg8: memref<1x10xf32, #tpu.memory_space<vmem>>, %arg9: memref<2x10xf32, #tpu.memory_space<vmem>>) attributes {dimension_semantics = [], scalar_prefetch = 0 : i64, scratch_operands = 0 : i64, tpu.core_type = #tpu.core_type<tc>} {
    %c0 = arith.constant 0 : index
    %c0_0 = arith.constant 0 : index
    %0 = vector.load %arg0[%c0, %c0_0] : memref<128x400xbf16, #tpu.memory_space<vmem>>, vector<128x400xbf16>
    %c0_1 = arith.constant 0 : index
    %c0_2 = arith.constant 0 : index
    %1 = vector.load %arg1[%c0_1, %c0_2] : memref<400x160xbf16, #tpu.memory_space<vmem>>, vector<400x160xbf16>
    %cst = arith.constant dense<0.000000e+00> : vector<128x160xf32>
    %2 = tpu.matmul %0, %1, %cst {dimension_numbers = #tpu.dot_dimension_numbers<[1], [0], [0], [1], [0, 0, 1, 1], [], []>} : vector<128x400xbf16>, vector<400x160xbf16>, vector<128x160xf32> -> vector<128x160xf32>
    %3 = vector.shape_cast %2 : vector<128x160xf32> to vector<4x32x160xf32>
    %cst_3 = arith.constant dense<0xFF800000> : vector<32x160xf32>
    %4 = vector.multi_reduction <maximumf>, %3, %cst_3 [0] : vector<4x32x160xf32> to vector<32x160xf32>
    %c0_4 = arith.constant 0 : index
    %c0_5 = arith.constant 0 : index
    %5 = vector.load %arg2[%c0_4, %c0_5] : memref<1x160xf32, #tpu.memory_space<vmem>>, vector<1x160xf32>
    %6 = vector.broadcast %5 : vector<1x160xf32> to vector<32x160xf32>
    %7 = arith.addf %4, %6 : vector<32x160xf32>
    %cst_6 = arith.constant 0.000000e+00 : f32
    %8 = vector.broadcast %cst_6 : f32 to vector<32x160xf32>
    %9 = arith.maximumf %7, %8 : vector<32x160xf32>
    %10 = vector.shape_cast %9 : vector<32x160xf32> to vector<2x16x160xf32>
    %11 = arith.truncf %10 : vector<2x16x160xf32> to vector<2x16x160xbf16>
    %cst_7 = arith.constant 0.000000e+00 : f32
    %12 = vector.broadcast %cst_7 : f32 to vector<16x256xf32>
    %13 = vector.extract_strided_slice %11 {offsets = [0, 0, 0], sizes = [2, 8, 160], strides = [1, 1, 1]} : vector<2x16x160xbf16> to vector<2x8x160xbf16>
    %14 = vector.shape_cast %13 : vector<2x8x160xbf16> to vector<16x160xbf16>
    %c0_8 = arith.constant 0 : index
    %c0_9 = arith.constant 0 : index
    %c0_10 = arith.constant 0 : index
    %15 = vector.load %arg3[%c0_8, %c0_9, %c0_10] : memref<5x160x256xbf16, #tpu.memory_space<vmem>>, vector<1x160x256xbf16>
    %16 = vector.shape_cast %15 : vector<1x160x256xbf16> to vector<160x256xbf16>
    %cst_11 = arith.constant dense<0.000000e+00> : vector<16x256xf32>
    %17 = tpu.matmul %14, %16, %cst_11 {dimension_numbers = #tpu.dot_dimension_numbers<[1], [0], [0], [1], [0, 0, 1, 1], [], []>} : vector<16x160xbf16>, vector<160x256xbf16>, vector<16x256xf32> -> vector<16x256xf32>
    %18 = arith.addf %12, %17 : vector<16x256xf32>
    %19 = vector.extract_strided_slice %11 {offsets = [0, 1, 0], sizes = [2, 8, 160], strides = [1, 1, 1]} : vector<2x16x160xbf16> to vector<2x8x160xbf16>
    %20 = vector.shape_cast %19 : vector<2x8x160xbf16> to vector<16x160xbf16>
    %c1 = arith.constant 1 : index
    %c0_12 = arith.constant 0 : index
    %c0_13 = arith.constant 0 : index
    %21 = vector.load %arg3[%c1, %c0_12, %c0_13] : memref<5x160x256xbf16, #tpu.memory_space<vmem>>, vector<1x160x256xbf16>
    %22 = vector.shape_cast %21 : vector<1x160x256xbf16> to vector<160x256xbf16>
    %cst_14 = arith.constant dense<0.000000e+00> : vector<16x256xf32>
    %23 = tpu.matmul %20, %22, %cst_14 {dimension_numbers = #tpu.dot_dimension_numbers<[1], [0], [0], [1], [0, 0, 1, 1], [], []>} : vector<16x160xbf16>, vector<160x256xbf16>, vector<16x256xf32> -> vector<16x256xf32>
    %24 = arith.addf %18, %23 : vector<16x256xf32>
    %25 = vector.extract_strided_slice %11 {offsets = [0, 2, 0], sizes = [2, 8, 160], strides = [1, 1, 1]} : vector<2x16x160xbf16> to vector<2x8x160xbf16>
    %26 = vector.shape_cast %25 : vector<2x8x160xbf16> to vector<16x160xbf16>
    %c2 = arith.constant 2 : index
    %c0_15 = arith.constant 0 : index
    %c0_16 = arith.constant 0 : index
    %27 = vector.load %arg3[%c2, %c0_15, %c0_16] : memref<5x160x256xbf16, #tpu.memory_space<vmem>>, vector<1x160x256xbf16>
    %28 = vector.shape_cast %27 : vector<1x160x256xbf16> to vector<160x256xbf16>
    %cst_17 = arith.constant dense<0.000000e+00> : vector<16x256xf32>
    %29 = tpu.matmul %26, %28, %cst_17 {dimension_numbers = #tpu.dot_dimension_numbers<[1], [0], [0], [1], [0, 0, 1, 1], [], []>} : vector<16x160xbf16>, vector<160x256xbf16>, vector<16x256xf32> -> vector<16x256xf32>
    %30 = arith.addf %24, %29 : vector<16x256xf32>
    %31 = vector.extract_strided_slice %11 {offsets = [0, 3, 0], sizes = [2, 8, 160], strides = [1, 1, 1]} : vector<2x16x160xbf16> to vector<2x8x160xbf16>
    %32 = vector.shape_cast %31 : vector<2x8x160xbf16> to vector<16x160xbf16>
    %c3 = arith.constant 3 : index
    %c0_18 = arith.constant 0 : index
    %c0_19 = arith.constant 0 : index
    %33 = vector.load %arg3[%c3, %c0_18, %c0_19] : memref<5x160x256xbf16, #tpu.memory_space<vmem>>, vector<1x160x256xbf16>
    %34 = vector.shape_cast %33 : vector<1x160x256xbf16> to vector<160x256xbf16>
    %cst_20 = arith.constant dense<0.000000e+00> : vector<16x256xf32>
    %35 = tpu.matmul %32, %34, %cst_20 {dimension_numbers = #tpu.dot_dimension_numbers<[1], [0], [0], [1], [0, 0, 1, 1], [], []>} : vector<16x160xbf16>, vector<160x256xbf16>, vector<16x256xf32> -> vector<16x256xf32>
    %36 = arith.addf %30, %35 : vector<16x256xf32>
    %37 = vector.extract_strided_slice %11 {offsets = [0, 4, 0], sizes = [2, 8, 160], strides = [1, 1, 1]} : vector<2x16x160xbf16> to vector<2x8x160xbf16>
    %38 = vector.shape_cast %37 : vector<2x8x160xbf16> to vector<16x160xbf16>
    %c4 = arith.constant 4 : index
    %c0_21 = arith.constant 0 : index
    %c0_22 = arith.constant 0 : index
    %39 = vector.load %arg3[%c4, %c0_21, %c0_22] : memref<5x160x256xbf16, #tpu.memory_space<vmem>>, vector<1x160x256xbf16>
    %40 = vector.shape_cast %39 : vector<1x160x256xbf16> to vector<160x256xbf16>
    %cst_23 = arith.constant dense<0.000000e+00> : vector<16x256xf32>
    %41 = tpu.matmul %38, %40, %cst_23 {dimension_numbers = #tpu.dot_dimension_numbers<[1], [0], [0], [1], [0, 0, 1, 1], [], []>} : vector<16x160xbf16>, vector<160x256xbf16>, vector<16x256xf32> -> vector<16x256xf32>
    %42 = arith.addf %36, %41 : vector<16x256xf32>
    %43 = vector.extract_strided_slice %42 {offsets = [0, 0], sizes = [16, 128], strides = [1, 1]} : vector<16x256xf32> to vector<16x128xf32>
    %44 = vector.extract_strided_slice %42 {offsets = [0, 128], sizes = [16, 128], strides = [1, 1]} : vector<16x256xf32> to vector<16x128xf32>
    %45 = arith.maximumf %43, %44 : vector<16x128xf32>
    %46 = vector.shape_cast %45 : vector<16x128xf32> to vector<2x4x2x128xf32>
    %cst_24 = arith.constant dense<0xFF800000> : vector<2x4x128xf32>
    %47 = vector.multi_reduction <maximumf>, %46, %cst_24 [2] : vector<2x4x2x128xf32> to vector<2x4x128xf32>
    %c0_25 = arith.constant 0 : index
    %c0_26 = arith.constant 0 : index
    %48 = vector.load %arg4[%c0_25, %c0_26] : memref<1x128xf32, #tpu.memory_space<vmem>>, vector<1x128xf32>
    %49 = vector.shape_cast %48 : vector<1x128xf32> to vector<1x1x128xf32>
    %50 = vector.broadcast %49 : vector<1x1x128xf32> to vector<2x4x128xf32>
    %51 = arith.addf %47, %50 : vector<2x4x128xf32>
    %cst_27 = arith.constant 0.000000e+00 : f32
    %52 = vector.broadcast %cst_27 : f32 to vector<2x4x128xf32>
    %53 = arith.maximumf %51, %52 : vector<2x4x128xf32>
    %54 = vector.shape_cast %53 : vector<2x4x128xf32> to vector<2x512xf32>
    %55 = arith.truncf %54 : vector<2x512xf32> to vector<2x512xbf16>
    %c0_28 = arith.constant 0 : index
    %c0_29 = arith.constant 0 : index
    %56 = vector.load %arg5[%c0_28, %c0_29] : memref<512x50xbf16, #tpu.memory_space<vmem>>, vector<512x50xbf16>
    %cst_30 = arith.constant dense<0.000000e+00> : vector<2x50xf32>
    %57 = tpu.matmul %55, %56, %cst_30 {dimension_numbers = #tpu.dot_dimension_numbers<[1], [0], [0], [1], [0, 0, 1, 1], [], []>} : vector<2x512xbf16>, vector<512x50xbf16>, vector<2x50xf32> -> vector<2x50xf32>
    %c0_31 = arith.constant 0 : index
    %c0_32 = arith.constant 0 : index
    %58 = vector.load %arg6[%c0_31, %c0_32] : memref<1x50xf32, #tpu.memory_space<vmem>>, vector<1x50xf32>
    %59 = vector.broadcast %58 : vector<1x50xf32> to vector<2x50xf32>
    %60 = arith.addf %57, %59 : vector<2x50xf32>
    %cst_33 = arith.constant 0.000000e+00 : f32
    %61 = vector.broadcast %cst_33 : f32 to vector<2x50xf32>
    %62 = arith.maximumf %60, %61 : vector<2x50xf32>
    %63 = arith.truncf %62 : vector<2x50xf32> to vector<2x50xbf16>
    %c0_34 = arith.constant 0 : index
    %c0_35 = arith.constant 0 : index
    %64 = vector.load %arg7[%c0_34, %c0_35] : memref<50x10xbf16, #tpu.memory_space<vmem>>, vector<50x10xbf16>
    %cst_36 = arith.constant dense<0.000000e+00> : vector<2x10xf32>
    %65 = tpu.matmul %63, %64, %cst_36 {dimension_numbers = #tpu.dot_dimension_numbers<[1], [0], [0], [1], [0, 0, 1, 1], [], []>} : vector<2x50xbf16>, vector<50x10xbf16>, vector<2x10xf32> -> vector<2x10xf32>
    %c0_37 = arith.constant 0 : index
    %c0_38 = arith.constant 0 : index
    %66 = vector.load %arg8[%c0_37, %c0_38] : memref<1x10xf32, #tpu.memory_space<vmem>>, vector<1x10xf32>
    %67 = vector.broadcast %66 : vector<1x10xf32> to vector<2x10xf32>
    %68 = arith.addf %65, %67 : vector<2x10xf32>
    %cst_39 = arith.constant dense<0xFF800000> : vector<2xf32>
    %69 = vector.multi_reduction <maximumf>, %68, %cst_39 [1] : vector<2x10xf32> to vector<2xf32>
    %70 = vector.shape_cast %69 : vector<2xf32> to vector<2x1xf32>
    %71 = vector.broadcast %70 : vector<2x1xf32> to vector<2x10xf32>
    %72 = arith.subf %68, %71 : vector<2x10xf32>
    %73 = math.exp %72 : vector<2x10xf32>
    %cst_40 = arith.constant dense<0.000000e+00> : vector<2xf32>
    %74 = vector.multi_reduction <add>, %73, %cst_40 [1] : vector<2x10xf32> to vector<2xf32>
    %75 = vector.shape_cast %74 : vector<2xf32> to vector<2x1xf32>
    %76 = math.log %75 : vector<2x1xf32>
    %77 = vector.broadcast %76 : vector<2x1xf32> to vector<2x10xf32>
    %78 = arith.subf %72, %77 : vector<2x10xf32>
    %c0_41 = arith.constant 0 : index
    %c0_42 = arith.constant 0 : index
    %79 = vector.load %arg9[%c0_41, %c0_42] : memref<2x10xf32, #tpu.memory_space<vmem>>, vector<2x10xf32>
    tpu.vector_store %arg9[%c0_41, %c0_42], %78 {strides = array<i32>} : memref<2x10xf32, #tpu.memory_space<vmem>>, vector<2x10xf32>,
    return
  }
}

</mosaic_0001>

<bundles_post_ra>
// kernel: net_forward.1
= control target key start
LH: loop header
LB: loop body
LE: loop exit
PB: predicated region body
PF: predicated region fallthrough
CT: control target
= control target key end

     0   :  { %vm518_vm0 = vcmask 130048   ;;  %s4092_s0 = inlined_call_operand.vmem [shape: bf16[128,400], index: 0, kind: input, shape index: {}]   ;;  %s4093_s1 = inlined_call_operand.vmem [shape: bf16[400,160], index: 1, kind: input, shape index: {}]   ;;  %s4094_s2 = inlined_call_operand.vmem [shape: f32[1,160], index: 2, kind: input, shape index: {}]   ;;  %s4095_s3 = inlined_call_operand.vmem [shape: bf16[5,160,256], index: 3, kind: input, shape index: {}]   ;;  %s4096_s4 = inlined_call_operand.vmem [shape: f32[1,128], index: 4, kind: input, shape index: {}]   ;;  %s4097_s5 = inlined_call_operand.vmem [shape: bf16[512,50], index: 5, kind: input, shape index: {}]   ;;  %s4098_s6 = inlined_call_operand.vmem [shape: f32[1,50], index: 6, kind: input, shape index: {}]   ;;  %s4099_s7 = inlined_call_operand.vmem [shape: bf16[50,10], index: 7, kind: input, shape index: {}]   ;;  %s4100_s8 = inlined_call_operand.vmem [shape: f32[1,10], index: 8, kind: input, shape index: {}]   ;;  %s4101_s9 = inlined_call_operand.hbm [shape: f32[2,10], index: 9, kind: output, shape index: {}]  }
   0x1   :  { %v2859_v0 = vld [vmem:[%s4093_s1 + $0x74] ss:$8 sps:$4 sm:$0xff]   ;;  %v2861_v1 = vld [vmem:[%s4093_s1 + $0x70] ss:$8 sps:$4 sm:$0xff]   ;;  %v2862_v2 = vld [vmem:[%s4093_s1 + $0x64] ss:$8 sps:$4 sm:$0xff]  }
   0x2   :  { %543 = vmatprep.subr.bf16.mxu0 %v2859_v0  ;;  %v2864_v3 = vld [vmem:[%s4093_s1 + $0x60] ss:$8 sps:$4 sm:$0xff]   ;;  %v2865_v4 = vld [vmem:[%s4093_s1 + $0x54] ss:$8 sps:$4 sm:$0xff]   ;;  %v2867_v5 = vld [vmem:[%s4093_s1 + $0x50] ss:$8 sps:$4 sm:$0xff]  }
   0x3   :  { %544 = vmatpush1.bf16.msra.mxu0 %v2861_v1  ;;  %v2868_v6 = vld [vmem:[%s4093_s1 + $0x44] ss:$8 sps:$4 sm:$0xff]   ;;  %v2877_v7 = vld [vmem:[%s4093_s1 + $0x174] ss:$8 sps:$4 sm:$0xff]   ;;  %v2879_v8 = vld [vmem:[%s4093_s1 + $0x170] ss:$8 sps:$4 sm:$0xff]  }
   0x4   :  { %545 = vmatprep.subr.bf16.mxu0 %v2862_v2  ;;  %v2870_v9 = vld [vmem:[%s4093_s1 + $0x40] ss:$8 sps:$4 sm:$0xff]   ;;  %656 = vmatprep.subr.bf16.mxu1 %v2877_v7  ;;  %v2883_v10 = vld [vmem:[%s4093_s1 + $0x164] ss:$8 sps:$4 sm:$0xff]   ;;  %v2871_v12 = vld [vmem:[%s4093_s1 + $0x34] ss:$8 sps:$4 sm:$0xff]  }
   0x5   :  { %657 = vmatpush1.bf16.msra.mxu1 %v2879_v8  ;;  %v2885_v11 = vld [vmem:[%s4093_s1 + $0x160] ss:$8 sps:$4 sm:$0xff]   ;;  %v2873_v13 = vld [vmem:[%s4093_s1 + $0x30] ss:$8 sps:$4 sm:$0xff]   ;;  %v2889_v14 = vld [vmem:[%s4093_s1 + $0x154] ss:$8 sps:$4 sm:$0xff]  }
   0x6   :  { %658 = vmatprep.subr.bf16.mxu1 %v2883_v10  ;;  %v2874_v15 = vld [vmem:[%s4093_s1 + $0x24] ss:$8 sps:$4 sm:$0xff]   ;;  %v2891_v16 = vld [vmem:[%s4093_s1 + $0x150] ss:$8 sps:$4 sm:$0xff]   ;;  %v2876_v18 = vld [vmem:[%s4093_s1 + $0x20] ss:$8 sps:$4 sm:$0xff]  }
   0x7   :  { %546 = vmatpush1.bf16.msra.mxu0 %v2864_v3  ;;  %v2895_v17 = vld [vmem:[%s4093_s1 + $0x144] ss:$8 sps:$4 sm:$0xff]   ;;  %v2880_v19 = vld [vmem:[%s4093_s1 + $0x14] ss:$8 sps:$4 sm:$0xff]   ;;  %v2897_v20 = vld [vmem:[%s4093_s1 + $0x140] ss:$8 sps:$4 sm:$0xff]  }
   0x8   :  { %547 = vmatprep.subr.bf16.mxu0 %v2865_v4  ;;  %v2901_v21 = vld [vmem:[%s4093_s1 + $0x134] ss:$8 sps:$4 sm:$0xff]   ;;  %v2882_v22 = vld [vmem:[%s4093_s1 + $0x10] ss:$8 sps:$4 sm:$0xff]   ;;  %v2886_v23 = vld [vmem:[%s4093_s1 + $0x4] ss:$8 sps:$4 sm:$0xff]  }
   0x9   :  { %659 = vmatpush1.bf16.msra.mxu1 %v2885_v11  ;;  %v2903_v24 = vld [vmem:[%s4093_s1 + $0x130] ss:$8 sps:$4 sm:$0xff]   ;;  %v2907_v25 = vld [vmem:[%s4093_s1 + $0x124] ss:$8 sps:$4 sm:$0xff]   ;;  %v2888_v26 = vld [vmem:[%s4093_s1] ss:$8 sps:$4 sm:$0xff]  }
   0xa   :  { %660 = vmatprep.subr.bf16.mxu1 %v2889_v14  ;;  %v2892_v27 = vld [vmem:[%s4093_s1 + $0xf4] ss:$8 sps:$4 sm:$0xff]   ;;  %v2909_v28 = vld [vmem:[%s4093_s1 + $0x120] ss:$8 sps:$4 sm:$0xff]   ;;  %v2894_v30 = vld [vmem:[%s4093_s1 + $0xf0] ss:$8 sps:$4 sm:$0xff]  }
   0xb   :  { %548 = vmatpush1.bf16.msra.mxu0 %v2867_v5  ;;  %v2913_v29 = vld [vmem:[%s4093_s1 + $0x114] ss:$8 sps:$4 sm:$0xff]   ;;  %v2898_v31 = vld [vmem:[%s4093_s1 + $0xe4] ss:$8 sps:$4 sm:$0xff]   ;;  %v2915_v32 = vld [vmem:[%s4093_s1 + $0x110] ss:$8 sps:$4 sm:$0xff]  }
   0xc   :  { %549 = vmatprep.subr.bf16.mxu0 %v2868_v6  ;;  %v2919_v33 = vld [vmem:[%s4093_s1 + $0x104] ss:$8 sps:$4 sm:$0xff]   ;;  %v2900_v35 = vld [vmem:[%s4093_s1 + $0xe0] ss:$8 sps:$4 sm:$0xff]   ;;  %v2904_v36 = vld [vmem:[%s4093_s1 + $0xd4] ss:$8 sps:$4 sm:$0xff]  }
   0xd   :  { %661 = vmatpush1.bf16.msra.mxu1 %v2891_v16  ;;  %v2933_v34 = vld [vmem:[%s4092_s0 + $0xc] ss:$16 sps:$4 sm:$0xff]   ;;  %v2921_v37 = vld [vmem:[%s4093_s1 + $0x100] ss:$8 sps:$4 sm:$0xff]   ;;  %v2939_v38 = vld [vmem:[%s4092_s0 + $0x4] ss:$16 sps:$4 sm:$0xff]  }
   0xe   :  { %662 = vmatprep.subr.bf16.mxu1 %v2895_v17  ;;  %v2925_v39 = vld [vmem:[%s4093_s1 + $0x184] ss:$8 sps:$4 sm:$0xff]   ;;  %2536 = vmatprep.mubr.msk.bf16.mxu1 %vm518_vm0, %v2933_v34  ;;  %v2906_v40 = vld [vmem:[%s4093_s1 + $0xd0] ss:$8 sps:$4 sm:$0xff]   ;;  %v2927_v41 = vld [vmem:[%s4093_s1 + $0x180] ss:$8 sps:$4 sm:$0xff]  }
   0xf   :  { %550 = vmatpush1.bf16.msra.mxu0 %v2870_v9  ;;  %575 = vmatprep.mubr.bf16.mxu0 %v2939_v38  ;;  %v2910_v42 = vld [vmem:[%s4093_s1 + $0xc4] ss:$8 sps:$4 sm:$0xff]   ;;  %v2931_v43 = vld [vmem:[%s4092_s0 + $0x8] ss:$16 sps:$4 sm:$0xff]   ;;  %v2916_v46 = vld [vmem:[%s4093_s1 + $0xb4] ss:$8 sps:$4 sm:$0xff]  }
  0x10   :  { %551 = vmatprep.subr.bf16.mxu0 %v2871_v12  ;;  %v2912_v44 = vld [vmem:[%s4093_s1 + $0xc0] ss:$8 sps:$4 sm:$0xff]   ;;  %v2940_v45 = vld [vmem:[%s4092_s0 + $0x2c] ss:$16 sps:$4 sm:$0xff]   ;;  %v2918_v47 = vld [vmem:[%s4093_s1 + $0xb0] ss:$8 sps:$4 sm:$0xff]  }
  0x11   :  { %663 = vmatpush1.bf16.msra.mxu1 %v2897_v20  ;;  %v2922_v48 = vld [vmem:[%s4093_s1 + $0xa4] ss:$8 sps:$4 sm:$0xff]   ;;  %v2942_v49 = vld [vmem:[%s4092_s0 + $0x28] ss:$16 sps:$4 sm:$0xff]   ;;  %v2928_v52 = vld [vmem:[%s4093_s1 + $0x94] ss:$8 sps:$4 sm:$0xff]  }
  0x12   :  { %664 = vmatprep.subr.bf16.mxu1 %v2901_v21  ;;  %v2924_v50 = vld [vmem:[%s4093_s1 + $0xa0] ss:$8 sps:$4 sm:$0xff]   ;;  %v2946_v51 = vld [vmem:[%s4092_s0 + $0x4c] ss:$16 sps:$4 sm:$0xff]   ;;  %v2930_v53 = vld [vmem:[%s4093_s1 + $0x90] ss:$8 sps:$4 sm:$0xff]  }
  0x13   :  { %552 = vmatpush1.bf16.msra.mxu0 %v2873_v13  ;;  %v2934_v54 = vld [vmem:[%s4093_s1 + $0x84] ss:$8 sps:$4 sm:$0xff]   ;;  %v2948_v55 = vld [vmem:[%s4092_s0 + $0x48] ss:$16 sps:$4 sm:$0xff]   ;;  %v2937_v58 = vld [vmem:[%s4092_s0] ss:$16 sps:$4 sm:$0xff]  }
  0x14   :  { %553 = vmatprep.subr.bf16.mxu0 %v2874_v15  ;;  %v2936_v56 = vld [vmem:[%s4093_s1 + $0x80] ss:$8 sps:$4 sm:$0xff]   ;;  %v2952_v57 = vld [vmem:[%s4092_s0 + $0x6c] ss:$16 sps:$4 sm:$0xff]   ;;  %v2943_v59 = vld [vmem:[%s4092_s0 + $0x24] ss:$16 sps:$4 sm:$0xff]  }
  0x15   :  { %665 = vmatpush1.bf16.msra.mxu1 %v2903_v24  ;;  %v2954_v60 = vld [vmem:[%s4092_s0 + $0x68] ss:$16 sps:$4 sm:$0xff]   ;;  %v2958_v61 = vld [vmem:[%s4092_s0 + $0x8c] ss:$16 sps:$4 sm:$0xff]   ;;  %v2945_v62 = vld [vmem:[%s4092_s0 + $0x20] ss:$16 sps:$4 sm:$0xff]  }
  0x16   :  { %666 = vmatprep.subr.bf16.mxu1 %v2907_v25  ;;  %v2949_v63 = vld [vmem:[%s4092_s0 + $0x44] ss:$16 sps:$4 sm:$0xff]   ;;  %v2960_v0 = vld [vmem:[%s4092_s0 + $0x88] ss:$16 sps:$4 sm:$0xff]   ;;  %v2964_v1 = vld [vmem:[%s4092_s0 + $0xac] ss:$16 sps:$4 sm:$0xff]  }
  0x17   :  { %554 = vmatpush1.bf16.msra.mxu0 %v2876_v18  ;;  %v2951_v2 = vld [vmem:[%s4092_s0 + $0x40] ss:$16 sps:$4 sm:$0xff]   ;;  %v2955_v3 = vld [vmem:[%s4092_s0 + $0x64] ss:$16 sps:$4 sm:$0xff]   ;;  %v2966_v4 = vld [vmem:[%s4092_s0 + $0xa8] ss:$16 sps:$4 sm:$0xff]  }
  0x18   :  { %555 = vmatprep.subr.bf16.mxu0 %v2880_v19  ;;  %v2970_v5 = vld [vmem:[%s4092_s0 + $0xcc] ss:$16 sps:$4 sm:$0xff]   ;;  %v2957_v6 = vld [vmem:[%s4092_s0 + $0x60] ss:$16 sps:$4 sm:$0xff]   ;;  %v2961_v7 = vld [vmem:[%s4092_s0 + $0x84] ss:$16 sps:$4 sm:$0xff]  }
  0x19   :  { %667 = vmatpush1.bf16.msra.mxu1 %v2909_v28  ;;  %v2972_v8 = vld [vmem:[%s4092_s0 + $0xc8] ss:$16 sps:$4 sm:$0xff]   ;;  %v2976_v9 = vld [vmem:[%s4092_s0 + $0xec] ss:$16 sps:$4 sm:$0xff]   ;;  %v2963_v10 = vld [vmem:[%s4092_s0 + $0x80] ss:$16 sps:$4 sm:$0xff]  }
  0x1a   :  { %668 = vmatprep.subr.bf16.mxu1 %v2913_v29  ;;  %v2967_v11 = vld [vmem:[%s4092_s0 + $0xa4] ss:$16 sps:$4 sm:$0xff]   ;;  %v2978_v12 = vld [vmem:[%s4092_s0 + $0xe8] ss:$16 sps:$4 sm:$0xff]   ;;  %v2969_v13 = vld [vmem:[%s4092_s0 + $0xa0] ss:$16 sps:$4 sm:$0xff]  }
  0x1b   :  { %556 = vmatpush1.bf16.msra.mxu0 %v2882_v22  ;;  %v2973_v14 = vld [vmem:[%s4092_s0 + $0xc4] ss:$16 sps:$4 sm:$0xff]   ;;  %v2975_v15 = vld [vmem:[%s4092_s0 + $0xc0] ss:$16 sps:$4 sm:$0xff]  }
  0x1c   :  { %557 = vmatprep.subr.bf16.mxu0 %v2886_v23  ;;  %v2979_v16 = vld [vmem:[%s4092_s0 + $0xe4] ss:$16 sps:$4 sm:$0xff]  }
  0x1d   :  { %669 = vmatpush1.bf16.msra.mxu1 %v2915_v32 }
  0x1e   :  { %670 = vmatprep.subr.bf16.mxu1 %v2919_v33 }
  0x1f   :  { %558 = vmatpush1.bf16.msra.mxu0 %v2888_v26 }
  0x20   :  { %559 = vmatprep.subr.bf16.mxu0 %v2892_v27 }
  0x21   :  { %671 = vmatpush1.bf16.msra.mxu1 %v2921_v37 }
  0x22   :  { %686 = vmatprep.subr.bf16.mxu1 %v2925_v39 }
  0x23   :  { %560 = vmatpush2.bf16.msra.mxu0 %v2894_v30 }
  0x24   :  { %561 = vmatprep.subr.bf16.mxu0 %v2898_v31 }
  0x25   :  { %687 = vmatpush2.bf16.msra.mxu1 %v2927_v41 }
  0x27   :  { %562 = vmatpush2.bf16.msra.mxu0 %v2900_v35 }
  0x28   :  { %563 = vmatprep.subr.bf16.mxu0 %v2904_v36  ;;  %689 = vmatmul.mubr.bf16.vlgmr.msra.gmra.mxu1 %v2931_v43 }
  0x29   :  { %2537 = vmatprep.mubr.msk.bf16.mxu1 %vm518_vm0, %v2940_v45 }
  0x2b   :  { %564 = vmatpush2.bf16.msra.mxu0 %v2906_v40 }
  0x2c   :  { %565 = vmatprep.subr.bf16.mxu0 %v2910_v42 }
  0x2f   :  { %566 = vmatpush2.bf16.msra.mxu0 %v2912_v44 }
  0x30   :  { %567 = vmatprep.subr.bf16.mxu0 %v2916_v46  ;;  %699 = vmatmul.mubr.bf16.gmra.mxu1 %v2942_v49 }
  0x31   :  { %2538 = vmatprep.mubr.msk.bf16.mxu1 %vm518_vm0, %v2946_v51 }
  0x33   :  { %568 = vmatpush2.bf16.msra.mxu0 %v2918_v47 }
  0x34   :  { %569 = vmatprep.subr.bf16.mxu0 %v2922_v48 }
  0x37   :  { %570 = vmatpush2.bf16.msra.mxu0 %v2924_v50 }
  0x38   :  { %571 = vmatprep.subr.bf16.mxu0 %v2928_v52  ;;  %709 = vmatmul.mubr.bf16.gmra.mxu1 %v2948_v55 }
  0x39   :  { %2539 = vmatprep.mubr.msk.bf16.mxu1 %vm518_vm0, %v2952_v57 }
  0x3b   :  { %572 = vmatpush2.bf16.msra.mxu0 %v2930_v53 }
  0x3c   :  { %573 = vmatprep.subr.bf16.mxu0 %v2934_v54 }
  0x3f   :  { %574 = vmatpush2.bf16.msra.mxu0 %v2936_v56 }
  0x40   :  { %719 = vmatmul.mubr.bf16.gmra.mxu1 %v2954_v60 }
  0x41   :  { %2540 = vmatprep.mubr.msk.bf16.mxu1 %vm518_vm0, %v2958_v61 }
  0x42   :  { %576 = vmatmul.mubr.bf16.vlgmr.msra.gmra.mxu0 %v2937_v58 }
  0x43   :  { %585 = vmatprep.mubr.bf16.mxu0 %v2943_v59 }
  0x48   :  { %729 = vmatmul.mubr.bf16.gmra.mxu1 %v2960_v0 }
  0x49   :  { %2541 = vmatprep.mubr.msk.bf16.mxu1 %vm518_vm0, %v2964_v1 }
  0x4a   :  { %586 = vmatmul.mubr.bf16.gmra.mxu0 %v2945_v62 }
  0x4b   :  { %595 = vmatprep.mubr.bf16.mxu0 %v2949_v63 }
  0x50   :  { %739 = vmatmul.mubr.bf16.gmra.mxu1 %v2966_v4 }
  0x51   :  { %2542 = vmatprep.mubr.msk.bf16.mxu1 %vm518_vm0, %v2970_v5 }
  0x52   :  { %596 = vmatmul.mubr.bf16.gmra.mxu0 %v2951_v2 }
  0x53   :  { %605 = vmatprep.mubr.bf16.mxu0 %v2955_v3 }
  0x58   :  { %749 = vmatmul.mubr.bf16.gmra.mxu1 %v2972_v8 }
  0x59   :  { %2543 = vmatprep.mubr.msk.bf16.mxu1 %vm518_vm0, %v2976_v9 }
  0x5a   :  { %606 = vmatmul.mubr.bf16.gmra.mxu0 %v2957_v6 }
  0x5b   :  { %615 = vmatprep.mubr.bf16.mxu0 %v2961_v7 }
  0x60   :  { %759 = vmatmul.mubr.bf16.gmra.mxu1 %v2978_v12 }
  0x62   :  { %616 = vmatmul.mubr.bf16.gmra.mxu0 %v2963_v10 }
  0x63   :  { %625 = vmatprep.mubr.bf16.mxu0 %v2967_v11 }
  0x6a   :  { %626 = vmatmul.mubr.bf16.gmra.mxu0 %v2969_v13 }
  0x6b   :  { %635 = vmatprep.mubr.bf16.mxu0 %v2973_v14 }
  0x6c   :  { %14 = vsyncpa [#allocation3], 0  ;;  %v2981_v17 = vld [vmem:[%s4092_s0 + $0xe0] ss:$16 sps:$4 sm:$0xff]   ;;  %v2984_v19 = vld [vmem:[%s4095_s3 + $0x114] ss:$8 sps:$4 sm:$0xff]  }
  0x6d   :  { %v2982_v18 = vld [vmem:[%s4095_s3 + $0x110] ss:$8 sps:$4 sm:$0xff]   ;;  %1040 = vmatprep.subr.bf16.mxu1 %v2984_v19  ;;  %v2985_v20 = vld [vmem:[%s4095_s3 + $0x100] ss:$8 sps:$4 sm:$0xff]   ;;  %v2987_v21 = vld [vmem:[%s4095_s3 + $0x104] ss:$8 sps:$4 sm:$0xff]  }
  0x6e   :  { %1041 = vmatpush1.bf16.msra.mxu1 %v2982_v18  ;;  %v2993_v22 = vld [vmem:[%s4095_s3 + $0x74] ss:$8 sps:$4 sm:$0xff]   ;;  %v2991_v23 = vld [vmem:[%s4095_s3 + $0x70] ss:$8 sps:$4 sm:$0xff]   ;;  %v2996_v24 = vld [vmem:[%s4095_s3 + $0x64] ss:$8 sps:$4 sm:$0xff]  }
  0x6f   :  { %1042 = vmatprep.subr.bf16.mxu1 %v2987_v21  ;;  %1189 = vmatprep.subr.bf16.mxu0 %v2993_v22  ;;  %v2994_v25 = vld [vmem:[%s4095_s3 + $0x60] ss:$8 sps:$4 sm:$0xff]   ;;  %v2988_v26 = vld [vmem:[%s4095_s3 + $0xf0] ss:$8 sps:$4 sm:$0xff]   ;;  %v2990_v27 = vld [vmem:[%s4095_s3 + $0xf4] ss:$8 sps:$4 sm:$0xff]  }
  0x70   :  { %1190 = vmatpush1.bf16.msra.mxu0 %v2991_v23  ;;  %v3002_v28 = vld [vmem:[%s4095_s3 + $0x54] ss:$8 sps:$4 sm:$0xff]   ;;  %v3000_v29 = vld [vmem:[%s4095_s3 + $0x50] ss:$8 sps:$4 sm:$0xff]   ;;  %v2997_v30 = vld [vmem:[%s4095_s3 + $0xe0] ss:$8 sps:$4 sm:$0xff]  }
  0x71   :  { %1191 = vmatprep.subr.bf16.mxu0 %v2996_v24  ;;  %v2999_v31 = vld [vmem:[%s4095_s3 + $0xe4] ss:$8 sps:$4 sm:$0xff]   ;;  %v3003_v33 = vld [vmem:[%s4095_s3 + $0x40] ss:$8 sps:$4 sm:$0xff]   ;;  %v3011_v34 = vld [vmem:[%s4095_s3 + $0x34] ss:$8 sps:$4 sm:$0xff]  }
  0x72   :  { %636 = vmatmul.mubr.bf16.gmra.mxu0 %v2975_v15  ;;  %1043 = vmatpush1.bf16.msra.mxu1 %v2985_v20  ;;  %v3005_v32 = vld [vmem:[%s4095_s3 + $0x44] ss:$8 sps:$4 sm:$0xff]   ;;  %v3009_v35 = vld [vmem:[%s4095_s3 + $0x30] ss:$8 sps:$4 sm:$0xff]   ;;  %v3008_v37 = vld [vmem:[%s4095_s3 + $0xd4] ss:$8 sps:$4 sm:$0xff]  }
  0x73   :  { %645 = vmatprep.mubr.bf16.mxu0 %v2979_v16  ;;  %1044 = vmatprep.subr.bf16.mxu1 %v2990_v27  ;;  %v3006_v36 = vld [vmem:[%s4095_s3 + $0xd0] ss:$8 sps:$4 sm:$0xff]   ;;  %v3017_v38 = vld [vmem:[%s4095_s3 + $0x24] ss:$8 sps:$4 sm:$0xff]   ;;  %v3015_v39 = vld [vmem:[%s4095_s3 + $0x20] ss:$8 sps:$4 sm:$0xff]  }
  0x74   :  { %1192 = vmatpush1.bf16.msra.mxu0 %v2994_v25  ;;  %v3020_v40 = vld [vmem:[%s4095_s3 + $0x14] ss:$8 sps:$4 sm:$0xff]   ;;  %v3018_v41 = vld [vmem:[%s4095_s3 + $0x10] ss:$8 sps:$4 sm:$0xff]   ;;  %v3012_v42 = vld [vmem:[%s4095_s3 + $0xc0] ss:$8 sps:$4 sm:$0xff]  }
  0x75   :  { %1193 = vmatprep.subr.bf16.mxu0 %v3002_v28  ;;  %v3014_v43 = vld [vmem:[%s4095_s3 + $0xc4] ss:$8 sps:$4 sm:$0xff]   ;;  %v3024_v45 = vld [vmem:[%s4095_s3] ss:$8 sps:$4 sm:$0xff]   ;;  %v3032_v46 = vld [vmem:[%s4095_s3 + $0x94] ss:$8 sps:$4 sm:$0xff]  }
  0x76   :  { %1045 = vmatpush1.bf16.msra.mxu1 %v2988_v26  ;;  %v3026_v44 = vld [vmem:[%s4095_s3 + $0x4] ss:$8 sps:$4 sm:$0xff]   ;;  %v3030_v47 = vld [vmem:[%s4095_s3 + $0x90] ss:$8 sps:$4 sm:$0xff]   ;;  %v3023_v48 = vld [vmem:[%s4095_s3 + $0xb4] ss:$8 sps:$4 sm:$0xff]  }
  0x77   :  { %1046 = vmatprep.subr.bf16.mxu1 %v2999_v31  ;;  %v3021_v49 = vld [vmem:[%s4095_s3 + $0xb0] ss:$8 sps:$4 sm:$0xff]   ;;  %v3035_v50 = vld [vmem:[%s4095_s3 + $0x84] ss:$8 sps:$4 sm:$0xff]   ;;  %v3033_v51 = vld [vmem:[%s4095_s3 + $0x80] ss:$8 sps:$4 sm:$0xff]  }
  0x78   :  { %1194 = vmatpush1.bf16.msra.mxu0 %v3000_v29  ;;  %v3029_v52 = vld [vmem:[%s4095_s3 + $0xa4] ss:$8 sps:$4 sm:$0xff]   ;;  %v3027_v53 = vld [vmem:[%s4095_s3 + $0xa0] ss:$8 sps:$4 sm:$0xff]   ;;  %v3041_v54 = vld [vmem:[%s4095_s3 + $0x254] ss:$8 sps:$4 sm:$0xff]  }
  0x79   :  { %1195 = vmatprep.subr.bf16.mxu0 %v3005_v32  ;;  %v3038_v55 = vld [vmem:[%s4095_s3 + $0x134] ss:$8 sps:$4 sm:$0xff]   ;;  %v3036_v56 = vld [vmem:[%s4095_s3 + $0x130] ss:$8 sps:$4 sm:$0xff]   ;;  %v3047_v57 = vld [vmem:[%s4095_s3 + $0x124] ss:$8 sps:$4 sm:$0xff]  }
  0x7a   :  { %646 = vmatmul.mubr.bf16.gmra.mxu0 %v2981_v17  ;;  %1047 = vmatpush1.bf16.msra.mxu1 %v2997_v30  ;;  %v3045_v58 = vld [vmem:[%s4095_s3 + $0x120] ss:$8 sps:$4 sm:$0xff]   ;;  %v3053_v59 = vld [vmem:[%s4095_s3 + $0x1b4] ss:$8 sps:$4 sm:$0xff]   ;;  %vm772_vm1 = vcmask 261120   ;;  %vm1232_vm2 = vcmask 1042432  }
  0x7b   :  { %1048 = vmatprep.subr.bf16.mxu1 %v3008_v37  ;;  %v812_v37 = vlaneseq  ;;  %vm1233_vm3 = vcmask 1046532   ;;  %vm878_vm4 = vsmask.f32 3328  ;;  %vm879_vm5 = vsmask.f32 7440 }
  0x7c   :  { %1196 = vmatpush1.bf16.msra.mxu0 %v3003_v33  ;;  %vm3738_vm6 = vmor %vm878_vm4, %vm879_vm5  ;;  %vm1421_vm7 = vsmask.f32 2304  ;;  %vm1422_vm8 = vsmask.f32 6416  ;;  %vm1622_vm11 = vcmask 1041408   ;;  %vm1623_vm12 = vcmask 1045508  }
  0x7d   :  { %1197 = vmatprep.subr.bf16.mxu0 %v3011_v34  ;;  %vm3752_vm9 = vmor %vm1232_vm2, %vm1233_vm3  ;;  %vm1946_vm14 = vcmask 1041409   ;;  %vm1949_vm15 = vcmask 1042434   ;;  %vm1952_vm0 = vcmask 1043459   ;;  %vm3197_vm2 = vmmov 0  }
  0x7e   :  { %1049 = vmatpush1.bf16.msra.mxu1 %v3006_v36  ;;  %vm1423_vm10 = vmor %vm1421_vm7, %vm1422_vm8  ;;  %vm2378_vm3 = vcmask 408576   ;;  %vm2426_vm4 = vcmask 74752  }
  0x7f   :  { %1050 = vmatprep.subr.bf16.mxu1 %v3014_v43  ;;  %vm1624_vm13 = vmor %vm1622_vm11, %vm1623_vm12 }
  0x80   :  { %1198 = vmatpush1.bf16.msra.mxu0 %v3009_v35 }
  0x81   :  { %1199 = vmatprep.subr.bf16.mxu0 %v3017_v38 }
  0x82   :  { %1051 = vmatpush1.bf16.msra.mxu1 %v3012_v42 }
  0x83   :  { %1052 = vmatprep.subr.bf16.mxu1 %v3023_v48  ;;  %v810_v48 = vld [vmem:[%s4094_s2] sm:$0x3] }
  0x84   :  { %1200 = vmatpush1.bf16.msra.mxu0 %v3015_v39 }
  0x85   :  { %1201 = vmatprep.subr.bf16.mxu0 %v3020_v40 }
  0x86   :  { %1053 = vmatpush1.bf16.msra.mxu1 %v3021_v49 }
  0x87   :  { %1054 = vmatprep.subr.bf16.mxu1 %v3029_v52 }
  0x88   :  { %1202 = vmatpush1.bf16.msra.mxu0 %v3018_v41  ;;  %v3653_v41 = vshrl.u32 %v812_v37, 7 }
  0x89   :  { %1203 = vmatprep.subr.bf16.mxu0 %v3026_v44 }
  0x8a   :  { %1055 = vmatpush1.bf16.msra.mxu1 %v3027_v53  ;;  %4104 = vst [vmem:[#allocation5_spill] sm:$0xff] %v3653_v41 }
  0x8b   :  { %1068 = vmatprep.subr.bf16.mxu1 %v3038_v55 }
  0x8c   :  { %1204 = vmatpush1.bf16.msra.mxu0 %v3024_v45  ;;  %v814_v45 = vsub.s32 0, %v3653_v41 }
  0x8d   :  { %1217 = vmatprep.subr.bf16.mxu0 %v3032_v46  ;;  %v818_v46 = vsub.s32 1, %v3653_v41 }
  0x8e   :  { %1069 = vmatpush2.bf16.msra.mxu1 %v3036_v56 }
  0x8f   :  { %1070 = vmatprep.subr.bf16.mxu1 %v3047_v57 }
  0x90   :  { %1218 = vmatpush2.bf16.msra.mxu0 %v3030_v47 }
  0x91   :  { %1219 = vmatprep.subr.bf16.mxu0 %v3035_v50 }
  0x92   :  { %1071 = vmatpush2.bf16.msra.mxu1 %v3045_v58  ;;  %v3660_v58 = vrot.slane %v810_v48, %v814_v45 }
  0x93   :  { %1374 = vmatprep.subr.bf16.mxu1 %v3053_v59  ;;  %v3662_v59 = vrot.slane %v810_v48, %v818_v46 }
  0x94   :  { %1220 = vmatpush2.bf16.msra.mxu0 %v3033_v51 }
  0x95   :  { %1575 = vmatprep.subr.bf16.mxu0 %v3041_v54 }
  0xe8   :  { %v690_v60 = vpop.f32.mrf.mxu1 }
  0xea   :  { %v692_v61 = vpop.f32.mrf.mxu1 }
  0xec   :  { %v3629_v62 = vpop.f32.mrf.mxu1 }
  0xee   :  { %v696_v63 = vpop.f32.mrf.mxu1 }
  0xf0   :  { %v3631_v0 = vpop.f32.mrf.mxu1 }
  0xf2   :  { %v702_v1 = vpop.f32.mrf.mxu1 }
  0xf4   :  { %v3633_v2 = vpop.f32.mrf.mxu1 }
  0xf6   :  { %v3635_v3 = vpop.f32.mrf.mxu1 }
  0xf8   :  { %v710_v4 = vpop.f32.mrf.mxu1 }
  0xfa   :  { %v712_v5 = vpop.f32.mrf.mxu1 }
  0xfc   :  { %v714_v7 = vpop.f32.mrf.mxu1 }
  0xfe   :  { %v716_v9 = vpop.f32.mrf.mxu1 }
 0x100   :  { %v3637_v11 = vpop.f32.mrf.mxu1 }
 0x102   :  { %v577_v6 = vpop.f32.mrf.mxu0  ;;  %v722_v13 = vpop.f32.mrf.mxu1 }
 0x103   :  { %v691_v55 = vadd.f32 %v690_v60, %v577_v6 }
 0x104   :  { %v579_v8 = vpop.f32.mrf.mxu0  ;;  %v3639_v15 = vpop.f32.mrf.mxu1 }
 0x105   :  { %v693_v47 = vadd.f32 %v692_v61, %v579_v8 }
 0x106   :  { %v581_v10 = vpop.f32.mrf.mxu0  ;;  %v3641_v17 = vpop.f32.mrf.mxu1 }
 0x107   :  { %v773_v61 = vsel %vm772_vm1, %v693_v47, -inf  ;;  %v695_v8 = vadd.f32 %v3629_v62, %v581_v10 }
 0x108   :  { %v583_v12 = vpop.f32.mrf.mxu0  ;;  %v730_v19 = vpop.f32.mrf.mxu1 }
 0x109   :  { %v697_v49 = vadd.f32 %v696_v63, %v583_v12 }
 0x10a   :  { %v587_v14 = vpop.f32.mrf.mxu0  ;;  %v732_v21 = vpop.f32.mrf.mxu1 }
 0x10b   :  { %v783_v63 = vsel %vm772_vm1, %v697_v49, -inf  ;;  %v701_v12 = vadd.f32 %v3631_v0, %v587_v14 }
 0x10c   :  { %v589_v16 = vpop.f32.mrf.mxu0  ;;  %v734_v23 = vpop.f32.mrf.mxu1 }
 0x10d   :  { %v703_v56 = vadd.f32 %v702_v1, %v589_v16 }
 0x10e   :  { %v591_v18 = vpop.f32.mrf.mxu0  ;;  %v736_v25 = vpop.f32.mrf.mxu1 }
 0x10f   :  { %v705_v62 = vadd.f32 %v3633_v2, %v591_v18 }
 0x110   :  { %v593_v20 = vpop.f32.mrf.mxu0  ;;  %v3643_v27 = vpop.f32.mrf.mxu1 }
 0x112   :  { %v597_v22 = vpop.f32.mrf.mxu0  ;;  %v3645_v29 = vpop.f32.mrf.mxu1 }
 0x113   :  { %v711_v52 = vadd.f32 %v710_v4, %v597_v22  ;;  %v707_v4 = vadd.f32 %v3635_v3, %v593_v20 }
 0x114   :  { %v599_v24 = vpop.f32.mrf.mxu0  ;;  %v3647_v32 = vpop.f32.mrf.mxu1 }
 0x115   :  { %v713_v53 = vadd.f32 %v712_v5, %v599_v24  ;;  %v769_v6 = vmax.f32 %v691_v55, %v711_v52  ;;  %v793_v24 = vsel %vm772_vm1, %v703_v56, -inf  ;;  %v3676_v20 = vsel %vm772_vm1, %v707_v4, -inf }
 0x116   :  { %v601_v26 = vpop.f32.mrf.mxu0  ;;  %v3651_v35 = vpop.f32.mrf.mxu1 }
 0x117   :  { %v715_v5 = vadd.f32 %v714_v7, %v601_v26 }
 0x118   :  { %v603_v28 = vpop.f32.mrf.mxu0  ;;  %v750_v39 = vpop.f32.mrf.mxu1 }
 0x119   :  { %v717_v54 = vadd.f32 %v716_v9, %v603_v28  ;;  %v774_v9 = vsel %vm772_vm1, %v713_v53, -inf  ;;  %v780_v28 = vmax.f32 %v695_v8, %v715_v5 }
 0x11a   :  { %v607_v30 = vpop.f32.mrf.mxu0  ;;  %v752_v43 = vpop.f32.mrf.mxu1  ;;  %v775_v26 = vmax.f32 %v773_v61, %v774_v9 }
 0x11b   :  { %v784_v16 = vsel %vm772_vm1, %v717_v54, -inf  ;;  %v721_v10 = vadd.f32 %v3637_v11, %v607_v30 }
 0x11c   :  { %v609_v31 = vpop.f32.mrf.mxu0  ;;  %v754_v51 = vpop.f32.mrf.mxu1 }
 0x11d   :  { %v723_v22 = vadd.f32 %v722_v13, %v609_v31 }
 0x11e   :  { %v3649_v33 = vpop.f32.mrf.mxu0  ;;  %v756_v1 = vpop.f32.mrf.mxu1 }
 0x11f   :  { %v725_v48 = vadd.f32 %v3639_v15, %v3649_v33 }
 0x120   :  { %v613_v34 = vpop.f32.mrf.mxu0  ;;  %v760_v31 = vpop.f32.mrf.mxu1 }
 0x121   :  { %v727_v2 = vadd.f32 %v3641_v17, %v613_v34  ;;  %v800_v8 = vmax.f32 %v705_v62, %v725_v48 }
 0x122   :  { %v617_v36 = vpop.f32.mrf.mxu0 }
 0x123   :  { %v731_v37 = vadd.f32 %v730_v19, %v617_v36  ;;  %v785_v36 = vmax.f32 %v783_v63, %v784_v16  ;;  %v804_v52 = vsel %vm772_vm1, %v727_v2, -inf }
 0x124   :  { %v619_v38 = vpop.f32.mrf.mxu0 }
 0x125   :  { %v733_v41 = vadd.f32 %v732_v21, %v619_v38  ;;  %v770_v0 = vmax.f32 %v769_v6, %v731_v37  ;;  %v794_v38 = vsel %vm772_vm1, %v723_v22, -inf }
 0x126   :  { %v621_v40 = vpop.f32.mrf.mxu0  ;;  %v795_v47 = vmax.f32 %v793_v24, %v794_v38 }
 0x127   :  { %v776_v3 = vsel %vm772_vm1, %v733_v41, -inf  ;;  %v735_v7 = vadd.f32 %v734_v23, %v621_v40 }
 0x128   :  { %v623_v42 = vpop.f32.mrf.mxu0  ;;  %v777_v30 = vmax.f32 %v775_v26, %v776_v3 }
 0x129   :  { %v737_v19 = vadd.f32 %v736_v25, %v623_v42  ;;  %v790_v25 = vmax.f32 %v701_v12, %v721_v10  ;;  %v781_v40 = vmax.f32 %v780_v28, %v735_v7 }
 0x12a   :  { %v627_v44 = vpop.f32.mrf.mxu0 }
 0x12b   :  { %v786_v41 = vsel %vm772_vm1, %v737_v19, -inf  ;;  %v741_v42 = vadd.f32 %v3643_v27, %v627_v44 }
 0x12c   :  { %v629_v50 = vpop.f32.mrf.mxu0 }
 0x12d   :  { %v743_v23 = vadd.f32 %v3645_v29, %v629_v50  ;;  %v787_v29 = vmax.f32 %v785_v36, %v786_v41  ;;  %v791_v33 = vmax.f32 %v790_v25, %v741_v42 }
 0x12e   :  { %v631_v57 = vpop.f32.mrf.mxu0 }
 0x12f   :  { %v796_v27 = vsel %vm772_vm1, %v743_v23, -inf  ;;  %v745_v44 = vadd.f32 %v3647_v32, %v631_v57  ;;  %v805_v32 = vmax.f32 %v3676_v20, %v804_v52 }
 0x130   :  { %v633_v60 = vpop.f32.mrf.mxu0  ;;  %v797_v57 = vmax.f32 %v795_v47, %v796_v27  ;;  %v3042_v27 = vld [vmem:[%s4095_s3 + $0x240] ss:$8 sps:$4 sm:$0xff]  }
 0x132   :  { %v637_v21 = vpop.f32.mrf.mxu0 }
 0x133   :  { %v751_v14 = vadd.f32 %v750_v39, %v637_v21 }
 0x134   :  { %v639_v13 = vpop.f32.mrf.mxu0 }
 0x135   :  { %v771_v11 = vmax.f32 %v770_v0, %v751_v14  ;;  %v753_v18 = vadd.f32 %v752_v43, %v639_v13  ;;  %v762_v43 = vpop.f32.mrf.mxu1 }
 0x136   :  { %v641_v39 = vpop.f32.mrf.mxu0 }
 0x137   :  { %v778_v45 = vsel %vm772_vm1, %v753_v18, -inf  ;;  %v755_v46 = vadd.f32 %v754_v51, %v641_v39  ;;  %v3687_v17 = vadd.f32 %v3660_v58, %v771_v11  ;;  %v747_v51 = vadd.f32 %v3651_v35, %v633_v60  ;;  %v764_v4 = vpop.f32.mrf.mxu1 }
 0x138   :  { %v779_v34 = vmax.f32 %v777_v30, %v778_v45  ;;  %v643_v49 = vpop.f32.mrf.mxu0 }
 0x139   :  { %v782_v50 = vmax.f32 %v781_v40, %v755_v46  ;;  %v757_v53 = vadd.f32 %v756_v1, %v643_v49  ;;  %v830_v37 = vmax.f32 %v3687_v17, 0.0  ;;  %v801_v1 = vmax.f32 %v800_v8, %v745_v44  ;;  %v766_v7 = vpop.f32.mrf.mxu1  ;;  %v3039_v46 = vld [vmem:[%s4095_s3 + $0x250] ss:$8 sps:$4 sm:$0xff]  }
 0x13a   :  { %v823_v54 = vadd.f32 %v3662_v59, %v779_v34  ;;  %v647_v15 = vpop.f32.mrf.mxu0  ;;  %v806_v6 = vsel %vm772_vm1, %v747_v51, -inf }
 0x13b   :  { %v824_v55 = vadd.f32 %v3660_v58, %v782_v50  ;;  %v788_v56 = vsel %vm772_vm1, %v757_v53, -inf  ;;  %v761_v61 = vadd.f32 %v760_v31, %v647_v15  ;;  %v807_v26 = vmax.f32 %v805_v32, %v806_v6  ;;  %v3050_v15 = vld [vmem:[%s4095_s3 + $0x234] ss:$8 sps:$4 sm:$0xff]  }
 0x13c   :  { %v831_v63 = vmax.f32 %v823_v54, 0.0  ;;  %v789_v12 = vmax.f32 %v787_v29, %v788_v56  ;;  %v649_v5 = vpop.f32.mrf.mxu0 }
 0x13d   :  { %v792_v35 = vmax.f32 %v791_v33, %v761_v61  ;;  %v763_v60 = vadd.f32 %v762_v43, %v649_v5  ;;  %v832_v24 = vmax.f32 %v824_v55, 0.0 }
 0x13e   :  { %v3699_v9 = vpack.c.bf16 %v831_v63, %v830_v37  ;;  %v825_v16 = vadd.f32 %v3662_v59, %v789_v12  ;;  %v651_v22 = vpop.f32.mrf.mxu0 }
 0x13f   :  { %v826_v62 = vadd.f32 %v3660_v58, %v792_v35  ;;  %v798_v10 = vsel %vm772_vm1, %v763_v60, -inf  ;;  %v765_v19 = vadd.f32 %v764_v4, %v651_v22  ;;  %v3104_v4 = vld [vmem:[%s4095_s3 + $0x2f4] ss:$8 sps:$4 sm:$0xff]   ;;  %v3113_v22 = vld [vmem:[%s4095_s3 + $0x2c4] ss:$8 sps:$4 sm:$0xff]  }
 0x140   :  { %v882_v21 = vshrl.u32 %v3699_v9, 16  ;;  %v885_v0 = vshll.u32 %v3699_v9, 16  ;;  %v833_v3 = vmax.f32 %v825_v16, 0.0  ;;  %v799_v14 = vmax.f32 %v797_v57, %v798_v10  ;;  %v653_v20 = vpop.f32.mrf.mxu0  ;;  %v3048_v57 = vld [vmem:[%s4095_s3 + $0x230] ss:$8 sps:$4 sm:$0xff]  }
 0x141   :  { %v802_v28 = vmax.f32 %v801_v1, %v765_v19  ;;  %v767_v36 = vadd.f32 %v766_v7, %v653_v20  ;;  %v834_v11 = vmax.f32 %v826_v62, 0.0  ;;  %v3056_v16 = vld [vmem:[%s4095_s3 + $0x224] ss:$8 sps:$4 sm:$0xff]   ;;  %v3051_v20 = vld [vmem:[%s4095_s3 + $0x1b0] ss:$8 sps:$4 sm:$0xff]  }
 0x142   :  { %v3706_v13 = vpack.c.bf16 %v833_v3, %v832_v24  ;;  %v827_v31 = vadd.f32 %v3662_v59, %v799_v14  ;;  %v884_v38 = vrot.slane %v882_v21, 4  ;;  %v887_v2 = vrot.slane %v885_v0, 5 }
 0x143   :  { %v808_v18 = vsel %vm772_vm1, %v767_v36, -inf  ;;  %v828_v30 = vadd.f32 %v3660_v58, %v802_v28  ;;  %v2791_v47 = vpack.c.bf16 %v834_v11, %v830_v37  ;;  %v3044_v58 = vld [vmem:[%s4095_s3 + $0x244] ss:$8 sps:$4 sm:$0xff]   ;;  %v1424_v48 = vrot.slane %v882_v21, 5  ;;  %v3054_v36 = vld [vmem:[%s4095_s3 + $0x220] ss:$8 sps:$4 sm:$0xff]  }
 0x144   :  { %v835_v25 = vmax.f32 %v827_v31, 0.0  ;;  %v809_v41 = vmax.f32 %v807_v26, %v808_v18  ;;  %v888_v23 = vor.u32 %v887_v2, %v884_v38  ;;  %v891_v39 = vshll.u32 %v3706_v13, 16  ;;  %v3059_v18 = vld [vmem:[%s4095_s3 + $0x1a4] ss:$8 sps:$4 sm:$0xff]  }
 0x145   :  { %v1425_v17 = vrot.slane %v885_v0, 6  ;;  %v1428_v34 = vshrl.u32 %v3706_v13, 16  ;;  %v1237_v5 = vrot.slane %v3706_v13, 5  ;;  %v2614_v24 = vrot.slane %v3699_v9, 9 }
 0x146   :  { %v3712_v40 = vpack.c.bf16 %v835_v25, %v834_v11  ;;  %v829_v42 = vadd.f32 %v3662_v59, %v809_v41  ;;  %v2792_v45 = vpack.c.bf16 %v835_v25, %v831_v63  ;;  %v836_v59 = vmax.f32 %v828_v30, 0.0  ;;  %v3062_v25 = vld [vmem:[%s4095_s3 + $0x214] ss:$8 sps:$4 sm:$0xff]   ;;  %v3057_v41 = vld [vmem:[%s4095_s3 + $0x1a0] ss:$8 sps:$4 sm:$0xff]  }
 0x147   :  { %v889_v29 = vrot.slane %v888_v23, 4  ;;  %v893_v50 = vrot.slane %v891_v39, 5  ;;  %v1426_v33 = vor.u32 %v1425_v17, %v1424_v48  ;;  %v1430_v55 = vrot.slane %v1428_v34, 5  ;;  %v3060_v23 = vld [vmem:[%s4095_s3 + $0x210] ss:$8 sps:$4 sm:$0xff]  }
 0x148   :  { %v896_v43 = vshrl.u32 %v3712_v40, 16  ;;  %v899_v49 = vshll.u32 %v3712_v40, 16  ;;  %v837_v52 = vmax.f32 %v829_v42, 0.0  ;;  %2613 = vmatprep.mubr.msk.bf16.mxu0 %vm772_vm1, %v2792_v45  ;;  %v1431_v56 = vrot.slane %v891_v39, 6  ;;  %v3065_v39 = vld [vmem:[%s4095_s3 + $0x194] ss:$8 sps:$4 sm:$0xff]  }
 0x149   :  { %1222 = vmatmul.mubr.bf16.vlgmr.msra.gmra.mxu0 %v2791_v47  ;;  %v2615_v1 = vrot.slane %v3712_v40, 9  ;;  %v894_v19 = vsel %vm3738_vm6, %v889_v29, %v893_v50  ;;  %v1427_v3 = vrot.slane %v1426_v33, 4  ;;  %v3775_v31 = vsel %vm3752_vm9, %v2614_v24, %v1237_v5  ;;  %v3068_v42 = vld [vmem:[%s4095_s3 + $0x204] ss:$8 sps:$4 sm:$0xff]   ;;  %v3063_v45 = vld [vmem:[%s4095_s3 + $0x190] ss:$8 sps:$4 sm:$0xff]  }
 0x14a   :  { %v3725_v53 = vpack.c.bf16 %v837_v52, %v836_v59  ;;  %1576 = vmatpush1.bf16.msra.mxu0 %v3039_v46  ;;  %v898_v44 = vrot.slane %v896_v43, 4  ;;  %v901_v51 = vrot.slane %v899_v49, 5  ;;  %v1434_v54 = vrot.slane %v896_v43, 5  ;;  %v3066_v46 = vld [vmem:[%s4095_s3 + $0x200] ss:$8 sps:$4 sm:$0xff]  }
 0x14b   :  { %1577 = vmatprep.subr.bf16.mxu0 %v3044_v58  ;;  %v1435_v61 = vrot.slane %v899_v49, 6  ;;  %v1432_v62 = vor.u32 %v1431_v56, %v1430_v55  ;;  %v3071_v47 = vld [vmem:[%s4095_s3 + $0x184] ss:$8 sps:$4 sm:$0xff]   ;;  %v3074_v58 = vld [vmem:[%s4095_s3 + $0x1f4] ss:$8 sps:$4 sm:$0xff]   ;;  %v1627_v5 = vrot.slane %v3706_v13, 6 }
 0x14c   :  { %v902_v8 = vor.u32 %v901_v51, %v898_v44  ;;  %v905_v37 = vshll.u32 %v3725_v53, 16  ;;  %v1241_v63 = vrot.slane %v3725_v53, 5  ;;  %v1438_v12 = vshrl.u32 %v3725_v53, 16  ;;  %v3069_v48 = vld [vmem:[%s4095_s3 + $0x180] ss:$8 sps:$4 sm:$0xff]  }
 0x14d   :  { %v1436_v32 = vor.u32 %v1435_v61, %v1434_v54  ;;  %v1433_v2 = vsel %vm1423_vm10, %v1427_v3, %v1432_v62  ;;  %v3072_v17 = vld [vmem:[%s4095_s3 + $0x1f0] ss:$8 sps:$4 sm:$0xff]   ;;  %v3077_v34 = vld [vmem:[%s4095_s3 + $0x174] ss:$8 sps:$4 sm:$0xff]   ;;  %v3080_v43 = vld [vmem:[%s4095_s3 + $0x1e4] ss:$8 sps:$4 sm:$0xff]  }
 0x14e   :  { %1578 = vmatpush1.bf16.msra.mxu0 %v3042_v27  ;;  %v903_v35 = vrot.slane %v902_v8, 4  ;;  %v907_v60 = vrot.slane %v905_v37, 5  ;;  %v1440_v6 = vrot.slane %v1438_v12, 5  ;;  %v1441_v10 = vrot.slane %v905_v37, 6  ;;  %v3075_v49 = vld [vmem:[%s4095_s3 + $0x170] ss:$8 sps:$4 sm:$0xff]  }
 0x14f   :  { %1579 = vmatprep.subr.bf16.mxu0 %v3050_v15  ;;  %v3763_v0 = vsel %vm3752_vm9, %v2615_v1, %v1241_v63  ;;  %v1437_v26 = vrot.slane %v1436_v32, 4  ;;  %v3078_v59 = vld [vmem:[%s4095_s3 + $0x1e0] ss:$8 sps:$4 sm:$0xff]   ;;  %v3083_v52 = vld [vmem:[%s4095_s3 + $0x164] ss:$8 sps:$4 sm:$0xff]   ;;  %v1631_v63 = vrot.slane %v3725_v53, 6 }
 0x150   :  { %v908_v21 = vsel %vm3738_vm6, %v903_v35, %v907_v60  ;;  %v1442_v28 = vor.u32 %v1441_v10, %v1440_v6  ;;  %v2637_v38 = vcombine.high %v3775_v31, %v3763_v0  ;;  %v3086_v29 = vld [vmem:[%s4095_s3 + $0x274] ss:$8 sps:$4 sm:$0xff]   ;;  %v3081_v50 = vld [vmem:[%s4095_s3 + $0x160] ss:$8 sps:$4 sm:$0xff]   ;;  %v3084_v27 = vld [vmem:[%s4095_s3 + $0x270] ss:$8 sps:$4 sm:$0xff]   ;;  %v2636_v60 = vcombine.low %v3775_v31, %v3763_v0 }
 0x151   :  { %v2568_v7 = vcombine.low %v894_v19, %v908_v21  ;;  %v2569_v14 = vcombine.high %v894_v19, %v908_v21  ;;  %v3089_v44 = vld [vmem:[%s4095_s3 + $0x154] ss:$8 sps:$4 sm:$0xff]   ;;  %v3092_v51 = vld [vmem:[%s4095_s3 + $0x264] ss:$8 sps:$4 sm:$0xff]   ;;  %v3087_v54 = vld [vmem:[%s4095_s3 + $0x150] ss:$8 sps:$4 sm:$0xff]  }
 0x152   :  { %1580 = vmatpush1.bf16.msra.mxu0 %v3048_v57  ;;  %v1443_v11 = vsel %vm1423_vm10, %v1437_v26, %v1442_v28  ;;  %v3090_v15 = vld [vmem:[%s4095_s3 + $0x260] ss:$8 sps:$4 sm:$0xff]   ;;  %v3095_v33 = vld [vmem:[%s4095_s3 + $0x144] ss:$8 sps:$4 sm:$0xff]   ;;  %v3098_v56 = vld [vmem:[%s4095_s3 + $0x1d4] ss:$8 sps:$4 sm:$0xff]  }
 0x153   :  { %2590 = vmatprep.mubr.msk.bf16.mxu1 %vm772_vm1, %v2569_v14  ;;  %1581 = vmatprep.subr.bf16.mxu0 %v3056_v16  ;;  %v2680_v30 = vcombine.high %v1433_v2, %v1443_v11  ;;  %v3093_v55 = vld [vmem:[%s4095_s3 + $0x140] ss:$8 sps:$4 sm:$0xff]   ;;  %v2679_v61 = vcombine.low %v1433_v2, %v1443_v11  ;;  %v3096_v8 = vld [vmem:[%s4095_s3 + $0x1d0] ss:$8 sps:$4 sm:$0xff]   ;;  %v3101_v37 = vld [vmem:[%s4095_s3 + $0x1c4] ss:$8 sps:$4 sm:$0xff]  }
 0x154   :  { %1073 = vmatmul.mubr.bf16.vlgmr.msra.gmra.mxu1 %v2568_v7  ;;  %v3099_v12 = vld [vmem:[%s4095_s3 + $0x1c0] ss:$8 sps:$4 sm:$0xff]   ;;  %v2703_v32 = vrot.slane %v3712_v40, 10  ;;  %v2702_v57 = vrot.slane %v3699_v9, 10  ;;  %v3102_v53 = vld [vmem:[%s4095_s3 + $0x2f0] ss:$8 sps:$4 sm:$0xff]  }
 0x155   :  { %1375 = vmatpush1.bf16.msra.mxu1 %v3051_v20  ;;  %2658 = vmatprep.mubr.msk.bf16.mxu1 %vm772_vm1, %v2637_v38  ;;  %v3107_v13 = vld [vmem:[%s4095_s3 + $0x2e4] ss:$8 sps:$4 sm:$0xff]   ;;  %v3105_v9 = vld [vmem:[%s4095_s3 + $0x2e0] ss:$8 sps:$4 sm:$0xff]   ;;  %v3110_v6 = vld [vmem:[%s4095_s3 + $0x2d4] ss:$8 sps:$4 sm:$0xff]  }
 0x156   :  { %1582 = vmatpush1.bf16.msra.mxu0 %v3054_v36  ;;  %2701 = vmatprep.mubr.msk.bf16.mxu0 %vm772_vm1, %v2680_v30  ;;  %v1632_v35 = vsel %vm1624_vm13, %v2703_v32, %v1631_v63  ;;  %v1628_v1 = vsel %vm1624_vm13, %v2702_v57, %v1627_v5  ;;  %v3108_v16 = vld [vmem:[%s4095_s3 + $0x2d0] ss:$8 sps:$4 sm:$0xff]   ;;  %v3111_v24 = vld [vmem:[%s4095_s3 + $0x2c0] ss:$8 sps:$4 sm:$0xff]   ;;  %v3116_v62 = vld [vmem:[%s4095_s3 + $0x2b4] ss:$8 sps:$4 sm:$0xff]  }
 0x157   :  { %1376 = vmatprep.subr.bf16.mxu1 %v3059_v18  ;;  %1583 = vmatprep.subr.bf16.mxu0 %v3062_v25  ;;  %v2725_v40 = vcombine.high %v1628_v1, %v1632_v35  ;;  %v3114_v10 = vld [vmem:[%s4095_s3 + $0x2b0] ss:$8 sps:$4 sm:$0xff]   ;;  %v3119_v19 = vld [vmem:[%s4095_s3 + $0x2a4] ss:$8 sps:$4 sm:$0xff]   ;;  %v3117_v21 = vld [vmem:[%s4095_s3 + $0x2a0] ss:$8 sps:$4 sm:$0xff]   ;;  %v2724_v31 = vcombine.low %v1628_v1, %v1632_v35 }
 0x158   :  { %v3122_v0 = vld [vmem:[%s4095_s3 + $0x294] ss:$8 sps:$4 sm:$0xff]   ;;  %v3120_v3 = vld [vmem:[%s4095_s3 + $0x290] ss:$8 sps:$4 sm:$0xff]   ;;  %v3125_v7 = vld [vmem:[%s4095_s3 + $0x284] ss:$8 sps:$4 sm:$0xff]  }
 0x159   :  { %1377 = vmatpush1.bf16.msra.mxu1 %v3057_v41  ;;  %v3123_v14 = vld [vmem:[%s4095_s3 + $0x280] ss:$8 sps:$4 sm:$0xff]   ;;  %v3128_v20 = vld [vmem:[%s4095_s3 + $0x314] ss:$8 sps:$4 sm:$0xff]   ;;  %v3126_v26 = vld [vmem:[%s4095_s3 + $0x310] ss:$8 sps:$4 sm:$0xff]  }
 0x15a   :  { %1584 = vmatpush1.bf16.msra.mxu0 %v3060_v23  ;;  %1378 = vmatprep.subr.bf16.mxu1 %v3065_v39  ;;  %v3131_v28 = vld [vmem:[%s4095_s3 + $0x304] ss:$8 sps:$4 sm:$0xff]   ;;  %v3129_v36 = vld [vmem:[%s4095_s3 + $0x300] ss:$8 sps:$4 sm:$0xff]   ;;  %v3132_v38 = vld [vmem:[%s4097_s5 + $0x78] sm:$0xff]  }
 0x15b   :  { %1585 = vmatprep.subr.bf16.mxu0 %v3068_v42  ;;  %v3133_v2 = vld [vmem:[%s4097_s5 + $0xf8] sm:$0xff]   ;;  %v3136_v25 = vld [vmem:[%s4097_s5 + $0x70] sm:$0xff]   ;;  %v3140_v39 = vld [vmem:[%s4097_s5 + $0x68] sm:$0xff]  }
 0x15c   :  { %v3134_v11 = vld [vmem:[%s4097_s5 + $0x38] sm:$0xff]   ;;  %v3137_v30 = vld [vmem:[%s4097_s5 + $0xf0] sm:$0xff]   ;;  %v3141_v42 = vld [vmem:[%s4097_s5 + $0xe8] sm:$0xff]  }
 0x15d   :  { %1379 = vmatpush1.bf16.msra.mxu1 %v3063_v45  ;;  %v3135_v18 = vld [vmem:[%s4097_s5 + $0xb8] sm:$0xff]   ;;  %v3138_v41 = vld [vmem:[%s4097_s5 + $0x30] sm:$0xff]   ;;  %v3142_v45 = vld [vmem:[%s4097_s5 + $0x28] sm:$0xff]  }
 0x15e   :  { %1586 = vmatpush1.bf16.msra.mxu0 %v3066_v46  ;;  %1380 = vmatprep.subr.bf16.mxu1 %v3071_v47  ;;  %v3139_v23 = vld [vmem:[%s4097_s5 + $0xb0] sm:$0xff]   ;;  %v3143_v46 = vld [vmem:[%s4097_s5 + $0xa8] sm:$0xff]   ;;  %v3144_v47 = vld [vmem:[%s4097_s5 + $0x60] sm:$0xff]  }
 0x15f   :  { %1587 = vmatprep.subr.bf16.mxu0 %v3074_v58  ;;  %v3145_v58 = vld [vmem:[%s4097_s5 + $0xe0] sm:$0xff]  }
 0x161   :  { %1381 = vmatpush1.bf16.msra.mxu1 %v3069_v48  ;;  %v3146_v48 = vld [vmem:[%s4097_s5 + $0x20] sm:$0xff]  }
 0x162   :  { %1588 = vmatpush1.bf16.msra.mxu0 %v3072_v17  ;;  %1382 = vmatprep.subr.bf16.mxu1 %v3077_v34  ;;  %v3147_v17 = vld [vmem:[%s4097_s5 + $0xa0] sm:$0xff]   ;;  %v3148_v34 = vld [vmem:[%s4097_s5 + $0x58] sm:$0xff]  }
 0x163   :  { %1589 = vmatprep.subr.bf16.mxu0 %v3080_v43  ;;  %v3149_v43 = vld [vmem:[%s4097_s5 + $0xd8] sm:$0xff]  }
 0x165   :  { %1383 = vmatpush1.bf16.msra.mxu1 %v3075_v49  ;;  %v3150_v49 = vld [vmem:[%s4097_s5 + $0x18] sm:$0xff]  }
 0x166   :  { %1590 = vmatpush1.bf16.msra.mxu0 %v3078_v59  ;;  %1384 = vmatprep.subr.bf16.mxu1 %v3083_v52  ;;  %v3151_v59 = vld [vmem:[%s4097_s5 + $0x98] sm:$0xff]   ;;  %v3152_v52 = vld [vmem:[%s4097_s5 + $0x50] sm:$0xff]  }
 0x167   :  { %1603 = vmatprep.subr.bf16.mxu0 %v3086_v29  ;;  %v3153_v29 = vld [vmem:[%s4097_s5 + $0xd0] sm:$0xff]  }
 0x169   :  { %1385 = vmatpush1.bf16.msra.mxu1 %v3081_v50  ;;  %v3154_v50 = vld [vmem:[%s4097_s5 + $0x10] sm:$0xff]  }
 0x16a   :  { %1604 = vmatpush2.bf16.msra.mxu0 %v3084_v27  ;;  %1386 = vmatprep.subr.bf16.mxu1 %v3089_v44  ;;  %v3155_v27 = vld [vmem:[%s4097_s5 + $0x90] sm:$0xff]   ;;  %v3156_v44 = vld [vmem:[%s4097_s5 + $0x48] sm:$0xff]  }
 0x16b   :  { %1605 = vmatprep.subr.bf16.mxu0 %v3092_v51  ;;  %v3157_v51 = vld [vmem:[%s4097_s5 + $0xc8] sm:$0xff]  }
 0x16d   :  { %1387 = vmatpush1.bf16.msra.mxu1 %v3087_v54  ;;  %v3158_v54 = vld [vmem:[%s4097_s5 + $0x8] sm:$0xff]  }
 0x16e   :  { %1606 = vmatpush2.bf16.msra.mxu0 %v3090_v15  ;;  %1388 = vmatprep.subr.bf16.mxu1 %v3095_v33  ;;  %v3159_v15 = vld [vmem:[%s4097_s5 + $0x88] sm:$0xff]   ;;  %v3160_v33 = vld [vmem:[%s4097_s5 + $0x40] sm:$0xff]  }
 0x16f   :  { %2793 = vmatprep.subr.bf16.mxu0 %v3132_v38 }
 0x171   :  { %1389 = vmatpush1.bf16.msra.mxu1 %v3093_v55  ;;  %1608 = vmatmul.mubr.bf16.vlgmr.msra.gmra.mxu0 %v2679_v61  ;;  %v3161_v55 = vld [vmem:[%s4097_s5 + $0xc0] sm:$0xff]  }
 0x172   :  { %1402 = vmatprep.subr.bf16.mxu1 %v3098_v56  ;;  %2794 = vmatpush3.bf16.msra.mxu0 %v3134_v11  ;;  %v3162_v56 = vld [vmem:[%s4097_s5] sm:$0xff]  }
 0x173   :  { %2795 = vmatprep.subr.bf16.mxu0 %v3136_v25  ;;  %v3163_v61 = vld [vmem:[%s4097_s5 + $0x80] sm:$0xff]  }
 0x175   :  { %1403 = vmatpush2.bf16.msra.mxu1 %v3096_v8  ;;  %v3194_v8 = vmov 0.0  }
 0x176   :  { %1404 = vmatprep.subr.bf16.mxu1 %v3101_v37  ;;  %2796 = vmatpush3.bf16.msra.mxu0 %v3138_v41 }
 0x177   :  { %2797 = vmatprep.subr.bf16.mxu0 %v3140_v39 }
 0x179   :  { %1405 = vmatpush2.bf16.msra.mxu1 %v3099_v12 }
 0x17a   :  { %1764 = vmatprep.subr.bf16.mxu1 %v3104_v4  ;;  %2798 = vmatpush3.bf16.msra.mxu0 %v3142_v45 }
 0x17b   :  { %2799 = vmatprep.subr.bf16.mxu0 %v3144_v47 }
 0x17c   :  { %1407 = vmatmul.mubr.bf16.vlgmr.msra.gmra.mxu1 %v2636_v60 }
 0x17d   :  { %1765 = vmatpush1.bf16.msra.mxu1 %v3102_v53  ;;  %2746 = vmatprep.mubr.msk.bf16.mxu1 %vm772_vm1, %v2725_v40  ;;  %vm2382_vm1 = vcmask 1040384  }
 0x17e   :  { %1766 = vmatprep.subr.bf16.mxu1 %v3107_v13  ;;  %2800 = vmatpush3.bf16.msra.mxu0 %v3146_v48 }
 0x17f   :  { %2801 = vmatprep.subr.bf16.mxu0 %v3148_v34 }
 0x181   :  { %1767 = vmatpush1.bf16.msra.mxu1 %v3105_v9 }
 0x182   :  { %1768 = vmatprep.subr.bf16.mxu1 %v3110_v6  ;;  %2802 = vmatpush3.bf16.msra.mxu0 %v3150_v49  ;;  %v3195_v6 = vmov 1983009808  }
 0x183   :  { %2803 = vmatprep.subr.bf16.mxu0 %v3152_v52 }
 0x185   :  { %1769 = vmatpush1.bf16.msra.mxu1 %v3108_v16  ;;  %v1817_v16 = vunpack.c.l.s4 %v3195_v6 }
 0x186   :  { %1770 = vmatprep.subr.bf16.mxu1 %v3113_v22  ;;  %2804 = vmatpush3.bf16.msra.mxu0 %v3154_v50 }
 0x187   :  { %2805 = vmatprep.subr.bf16.mxu0 %v3156_v44 }
 0x189   :  { %1771 = vmatpush1.bf16.msra.mxu1 %v3111_v24 }
 0x18a   :  { %1772 = vmatprep.subr.bf16.mxu1 %v3116_v62  ;;  %2806 = vmatpush3.bf16.msra.mxu0 %v3158_v54 }
 0x18b   :  { %2807 = vmatprep.subr.bf16.mxu0 %v3160_v33 }
 0x18d   :  { %1773 = vmatpush1.bf16.msra.mxu1 %v3114_v10 }
 0x18e   :  { %1774 = vmatprep.subr.bf16.mxu1 %v3119_v19  ;;  %2808 = vmatpush3.bf16.msra.mxu0 %v3162_v56 }
 0x18f   :  { %2842 = vmatprep.subr.bf16.mxu0 %v3194_v8 }
 0x191   :  { %1775 = vmatpush1.bf16.msra.mxu1 %v3117_v21 }
 0x192   :  { %1776 = vmatprep.subr.bf16.mxu1 %v3122_v0  ;;  %v1818_v0 = vunpack.c.0.s8 %v1817_v16 }
 0x195   :  { %1777 = vmatpush1.bf16.msra.mxu1 %v3120_v3 }
 0x196   :  { %1778 = vmatprep.subr.bf16.mxu1 %v3125_v7 }
 0x199   :  { %1779 = vmatpush1.bf16.msra.mxu1 %v3123_v14 }
 0x19a   :  { %1792 = vmatprep.subr.bf16.mxu1 %v3128_v20 }
 0x19d   :  { %1793 = vmatpush2.bf16.msra.mxu1 %v3126_v26 }
 0x19e   :  { %1794 = vmatprep.subr.bf16.mxu1 %v3131_v28 }
 0x1a1   :  { %1795 = vmatpush2.bf16.msra.mxu1 %v3129_v36 }
 0x1a2   :  { %2815 = vmatprep.subr.bf16.mxu1 %v3133_v2  ;;  %v4109_v2 = vld [vmem:[#allocation5_spill] sm:$0xff] }
 0x1a3   :  { %v4038_v11 = vsub.s32 %v1818_v0, %v4109_v2 }
 0x1a4   :  { %1797 = vmatmul.mubr.bf16.vlgmr.msra.gmra.mxu1 %v2724_v31 }
 0x1a5   :  { %2816 = vmatpush3.bf16.msra.mxu1 %v3135_v18 }
 0x1a6   :  { %2817 = vmatprep.subr.bf16.mxu1 %v3137_v30 }
 0x1a9   :  { %2818 = vmatpush3.bf16.msra.mxu1 %v3139_v23 }
 0x1aa   :  { %2819 = vmatprep.subr.bf16.mxu1 %v3141_v42 }
 0x1ad   :  { %2820 = vmatpush3.bf16.msra.mxu1 %v3143_v46 }
 0x1ae   :  { %2821 = vmatprep.subr.bf16.mxu1 %v3145_v58 }
 0x1b1   :  { %2822 = vmatpush3.bf16.msra.mxu1 %v3147_v17 }
 0x1b2   :  { %2823 = vmatprep.subr.bf16.mxu1 %v3149_v43 }
 0x1b5   :  { %2824 = vmatpush3.bf16.msra.mxu1 %v3151_v59 }
 0x1b6   :  { %2825 = vmatprep.subr.bf16.mxu1 %v3153_v29 }
 0x1b9   :  { %2826 = vmatpush3.bf16.msra.mxu1 %v3155_v27 }
 0x1ba   :  { %2827 = vmatprep.subr.bf16.mxu1 %v3157_v51 }
 0x1bd   :  { %2828 = vmatpush3.bf16.msra.mxu1 %v3159_v15 }
 0x1be   :  { %2829 = vmatprep.subr.bf16.mxu1 %v3161_v55 }
 0x1c1   :  { %2830 = vmatpush3.bf16.msra.mxu1 %v3163_v61 }
 0x209   :  { %v1223_v12 = vpop.f32.mrf.mxu0 }
 0x20b   :  { %v1225_v5 = vpop.f32.mrf.mxu0 }
 0x20d   :  { %v1227_v57 = vpop.f32.mrf.mxu0 }
 0x20f   :  { %v1229_v53 = vpop.f32.mrf.mxu0 }
 0x214   :  { %v1074_v37 = vpop.f32.mrf.mxu1 }
 0x215   :  { %v1224_v40 = vadd.f32 %v1223_v12, %v1074_v37 }
 0x216   :  { %v1076_v63 = vpop.f32.mrf.mxu1 }
 0x217   :  { %v1226_v9 = vadd.f32 %v1225_v5, %v1076_v63 }
 0x218   :  { %v1078_v4 = vpop.f32.mrf.mxu1 }
 0x219   :  { %v1228_v19 = vadd.f32 %v1227_v57, %v1078_v4 }
 0x21a   :  { %v1080_v32 = vpop.f32.mrf.mxu1 }
 0x21b   :  { %v1230_v21 = vadd.f32 %v1229_v53, %v1080_v32 }
 0x231   :  { %v1609_v1 = vpop.f32.mrf.mxu0 }
 0x233   :  { %v1611_v22 = vpop.f32.mrf.mxu0 }
 0x235   :  { %v1613_v3 = vpop.f32.mrf.mxu0 }
 0x237   :  { %v1615_v18 = vpop.f32.mrf.mxu0 }
 0x23c   :  { %v1408_v35 = vpop.f32.mrf.mxu1 }
 0x23d   :  { %v1417_v24 = vadd.f32 %v1408_v35, %v1224_v40 }
 0x23e   :  { %v1410_v60 = vpop.f32.mrf.mxu1 }
 0x23f   :  { %v1418_v62 = vadd.f32 %v1410_v60, %v1226_v9  ;;  %v1618_v26 = vadd.f32 %v1609_v1, %v1417_v24 }
 0x240   :  { %v1412_v13 = vpop.f32.mrf.mxu1 }
 0x241   :  { %v1419_v14 = vadd.f32 %v1412_v13, %v1228_v19  ;;  %v1619_v28 = vadd.f32 %v1611_v22, %v1418_v62 }
 0x242   :  { %v1414_v10 = vpop.f32.mrf.mxu1 }
 0x243   :  { %v1420_v20 = vadd.f32 %v1414_v10, %v1230_v21  ;;  %v1620_v41 = vadd.f32 %v1613_v3, %v1419_v14 }
 0x245   :  { %v1621_v23 = vadd.f32 %v1615_v18, %v1420_v20 }
 0x264   :  { %v1798_v7 = vpop.f32.mrf.mxu1 }
 0x265   :  { %v1807_v31 = vadd.f32 %v1798_v7, %v1618_v26  ;;  %v2747_v7 = vld [vmem:[%s4096_s4] ss:$0 sm:$0xff] }
 0x266   :  { %v1800_v36 = vpop.f32.mrf.mxu1 }
 0x267   :  { %v1808_v38 = vadd.f32 %v1800_v36, %v1619_v28 }
 0x268   :  { %v1802_v25 = vpop.f32.mrf.mxu1 }
 0x269   :  { %v1811_v30 = vmax.f32 %v1807_v31, %v1808_v38  ;;  %v1809_v46 = vadd.f32 %v1802_v25, %v1620_v41 }
 0x26a   :  { %v1804_v39 = vpop.f32.mrf.mxu1 }
 0x26b   :  { %v1815_v42 = vcombine.high %v1811_v30, %v1811_v30  ;;  %v1822_v45 = vrot.slane %v1811_v30, %v4038_v11  ;;  %v1810_v47 = vadd.f32 %v1804_v39, %v1621_v23 }
 0x26d   :  { %v1829_v58 = vrot.slane %v1815_v42, %v4038_v11  ;;  %v1830_v48 = vcombine.high %v1822_v45, %v1822_v45  ;;  %v1858_v17 = vsel %vm1622_vm11, %v1822_v45, -inf  ;;  %v1812_v34 = vmax.f32 %v1809_v46, %v1810_v47 }
 0x26e   :  { %v1859_v43 = vrot.slane %v1858_v17, 4 }
 0x26f   :  { %v1831_v49 = vcombine.high %v1829_v58, %v1829_v58  ;;  %v1865_v59 = vsel %vm1622_vm11, %v1830_v48, -inf  ;;  %v1872_v52 = vsel %vm1622_vm11, %v1829_v58, -inf  ;;  %v1832_v29 = vcombine.high %v1812_v34, %v1812_v34 }
 0x270   :  { %v1860_v50 = vmax.f32 %v1858_v17, %v1859_v43  ;;  %v1866_v27 = vrot.slane %v1865_v59, 4  ;;  %v1873_v44 = vrot.slane %v1872_v52, 4  ;;  %v1839_v51 = vrot.slane %v1812_v34, %v4038_v11 }
 0x271   :  { %v1879_v54 = vsel %vm1622_vm11, %v1831_v49, -inf  ;;  %v1846_v15 = vrot.slane %v1832_v29, %v4038_v11 }
 0x272   :  { %v1861_v33 = vrot.slane %v1860_v50, 2  ;;  %v1867_v55 = vmax.f32 %v1865_v59, %v1866_v27  ;;  %v1874_v56 = vmax.f32 %v1872_v52, %v1873_v44  ;;  %v1880_v61 = vrot.slane %v1879_v54, 4 }
 0x273   :  { %v1847_v37 = vcombine.high %v1839_v51, %v1839_v51  ;;  %v1848_v63 = vcombine.high %v1846_v15, %v1846_v15  ;;  %v1886_v12 = vsel %vm1622_vm11, %v1839_v51, -inf  ;;  %v1900_v4 = vsel %vm1622_vm11, %v1846_v15, -inf }
 0x274   :  { %v1862_v5 = vmax.f32 %v1860_v50, %v1861_v33  ;;  %v1868_v32 = vrot.slane %v1867_v55, 2  ;;  %v1875_v57 = vrot.slane %v1874_v56, 2  ;;  %v1881_v35 = vmax.f32 %v1879_v54, %v1880_v61 }
 0x275   :  { %v1887_v53 = vrot.slane %v1886_v12, 4  ;;  %v1893_v60 = vsel %vm1622_vm11, %v1847_v37, -inf  ;;  %v1901_v1 = vrot.slane %v1900_v4, 4  ;;  %v1907_v13 = vsel %vm1622_vm11, %v1848_v63, -inf }
 0x276   :  { %v1863_v40 = vrot.slane %v1862_v5, 1  ;;  %v1869_v9 = vmax.f32 %v1867_v55, %v1868_v32  ;;  %v1876_v6 = vmax.f32 %v1874_v56, %v1875_v57  ;;  %v1882_v16 = vrot.slane %v1881_v35, 2 }
 0x277   :  { %v1888_v22 = vmax.f32 %v1886_v12, %v1887_v53  ;;  %v1894_v24 = vrot.slane %v1893_v60, 4  ;;  %v1902_v62 = vmax.f32 %v1900_v4, %v1901_v1  ;;  %v1908_v10 = vrot.slane %v1907_v13, 4 }
 0x278   :  { %v1864_v19 = vmax.f32 %v1862_v5, %v1863_v40  ;;  %v1870_v21 = vrot.slane %v1869_v9, 1  ;;  %v1877_v0 = vrot.slane %v1876_v6, 1  ;;  %v1883_v3 = vmax.f32 %v1881_v35, %v1882_v16 }
 0x279   :  { %v1889_v14 = vrot.slane %v1888_v22, 2  ;;  %v1895_v20 = vmax.f32 %v1893_v60, %v1894_v24  ;;  %v1903_v26 = vrot.slane %v1902_v62, 2  ;;  %v1909_v28 = vmax.f32 %v1907_v13, %v1908_v10 }
 0x27a   :  { %v1871_v36 = vmax.f32 %v1869_v9, %v1870_v21  ;;  %v1878_v31 = vmax.f32 %v1876_v6, %v1877_v0  ;;  %v1884_v38 = vrot.slane %v1883_v3, 1  ;;  %v1921_v39 = vadd.f32 %v2747_v7, %v1864_v19 }
 0x27b   :  { %v1890_v18 = vmax.f32 %v1888_v22, %v1889_v14  ;;  %v1896_v25 = vrot.slane %v1895_v20, 2  ;;  %v1904_v30 = vmax.f32 %v1902_v62, %v1903_v26  ;;  %v1910_v41 = vrot.slane %v1909_v28, 2 }
 0x27c   :  { %v1885_v23 = vmax.f32 %v1883_v3, %v1884_v38  ;;  %v1922_v42 = vadd.f32 %v2747_v7, %v1871_v36  ;;  %v1923_v45 = vadd.f32 %v2747_v7, %v1878_v31  ;;  %v1929_v50 = vmax.f32 %v1921_v39, 0.0  ;;  %v3166_v38 = vld [vmem:[%s4099_s7 + $0x8] sm:$0xff]  }
 0x27d   :  { %v1891_v46 = vrot.slane %v1890_v18, 1  ;;  %v1897_v47 = vmax.f32 %v1895_v20, %v1896_v25  ;;  %v1905_v58 = vrot.slane %v1904_v30, 1  ;;  %v1911_v48 = vmax.f32 %v1909_v28, %v1910_v41  ;;  %v2748_v41 = vld [vmem:[%s4098_s6] ss:$0 sm:$0xff]  ;;  %s3198_s6 = smov [#allocation2]  }
 0x27e   :  { %v1930_v17 = vmax.f32 %v1922_v42, 0.0  ;;  %v1931_v34 = vmax.f32 %v1923_v45, 0.0  ;;  %v1924_v43 = vadd.f32 %v2747_v7, %v1885_v23  ;;  %v3196_v12 = vmov 1934713408  }
 0x27f   :  { %v1892_v49 = vmax.f32 %v1890_v18, %v1891_v46  ;;  %v1898_v59 = vrot.slane %v1897_v47, 1  ;;  %v1906_v52 = vmax.f32 %v1904_v30, %v1905_v58  ;;  %v1912_v29 = vrot.slane %v1911_v48, 1  ;;  %v3167_v18 = vld [vmem:[%s4099_s7] sm:$0xff]  }
 0x280   :  { %v1945_v27 = vrot.slane %v1930_v17, 7  ;;  %v1932_v15 = vmax.f32 %v1924_v43, 0.0  ;;  %v1948_v33 = vrot.slane %v1931_v34, 6  ;;  %v1979_v4 = vunpack.c.l.s4 %v3196_v12 }
 0x281   :  { %v1899_v44 = vmax.f32 %v1897_v47, %v1898_v59  ;;  %v1913_v51 = vmax.f32 %v1911_v48, %v1912_v29  ;;  %v1927_v54 = vadd.f32 %v2747_v7, %v1906_v52  ;;  %v1925_v55 = vadd.f32 %v2747_v7, %v1892_v49  ;;  %v2781_v49 = vld [vmem:[%s4100_s8] ss:$0 sm:$0xff]  ;;  %s2446_s8 = sshll.u32 %s3198_s6, 4  ;;  %s2447_s8 = int_to_ptr.vmem [resolvable:$true] %s2446_s8 }
 0x282   :  { %v1947_v63 = vsel %vm1946_vm14, %v1945_v27, %v1929_v50  ;;  %v1951_v57 = vrot.slane %v1932_v15, 5  ;;  %v1980_v40 = vunpack.c.0.s8 %v1979_v4  ;;  %s3172_s14 = scalar_lea.vmem %s2447_s8, 32  ;;  %p3177_p1 = scmp.lt.s32.totalorder %s2447_s8, %s2447_s8 }
 0x283   :  { %v1926_v56 = vadd.f32 %v2747_v7, %v1899_v44  ;;  %v1935_v61 = vmax.f32 %v1927_v54, 0.0  ;;  %v1928_v37 = vadd.f32 %v2747_v7, %v1913_v51  ;;  %v1950_v53 = vsel %vm1949_vm15, %v1948_v33, %v1947_v63  ;;  %v3164_v7 = vld [vmem:[%s4099_s7 + $0x18] ss:$0 sps:$4 sm:$0x11]   ;;  %p3173_p0 = scmp.ne.s32.totalorder %s2447_s8, %s3172_s14  ;;  %p3178_p2 = scmp.lt.s32.totalorder %s3172_s14, %s3172_s14 }
 0x284   :  { %v1933_v60 = vmax.f32 %v1925_v55, 0.0  ;;  %v1953_v9 = vsel %vm1952_vm0, %v1951_v57, %v1950_v53  ;;  %v1983_v10 = vsub.s32 %v1980_v40, %v4109_v2  ;;  %v3165_v2 = vld [vmem:[%s4099_s7 + $0x10] sm:$0xff]  }
 0x285   :  { %v1934_v5 = vmax.f32 %v1926_v56, 0.0  ;;  %v1936_v32 = vmax.f32 %v1928_v37, 0.0  ;;  %v1956_v35 = vrot.slane %v1935_v61, 6  ;;  %v1967_v24 = vrot.slane %v1953_v9, %v4038_v11  ;;  %p3179_p3 = por %p3178_p2, %p3177_p1 }
 0x287   :  { %v1954_v1 = vrot.slane %v1934_v5, 7  ;;  %v1958_v13 = vrot.slane %v1936_v32, 5  ;;  %p3180_p4 = pnand %p3179_p3, %p3173_p0 }
 0x289   :  { %v1955_v6 = vsel %vm1946_vm14, %v1954_v1, %v1933_v60 }
 0x28a   :  { %v1957_v16 = vsel %vm1949_vm15, %v1956_v35, %v1955_v6 }
 0x28b   :  { %v1959_v22 = vsel %vm1952_vm0, %v1958_v13, %v1957_v16 }
 0x28c   :  { %v1975_v62 = vrot.slane %v1959_v22, %v4038_v11  ;;  %v2384_v11 = vsel %vm2382_vm1, %v3164_v7, 0 }
 0x28e   :  { %v1976_v19 = vcombine.low %v1967_v24, %v1975_v62  ;;  %v1977_v21 = vcombine.high %v1967_v24, %v1975_v62 }
 0x290   :  { %v1984_v0 = vrot.slane %v1976_v19, %v1983_v10  ;;  %v1991_v3 = vrot.slane %v1977_v21, %v1983_v10 }
 0x292   :  { %v1992_v14 = vcombine.high %v1984_v0, %v3194_v8  ;;  %v1993_v20 = vcombine.high %v1991_v3, %v3194_v8  ;;  %v1994_v36 = vpack.c.bf16 %v1984_v0, %v1984_v0  ;;  %v1996_v31 = vpack.c.bf16 %v1991_v3, %v1991_v3 }
 0x294   :  { %v1995_v26 = vpack.c.bf16 %v1992_v14, %v1992_v14  ;;  %v1997_v28 = vpack.c.bf16 %v1993_v20, %v1993_v20 }
 0x296   :  { %2293 = vmatprep.mubr.bf16.mxu0 %v1995_v26  ;;  %2333 = vmatprep.mubr.bf16.mxu1 %v1997_v28 }
 0x297   :  { %2294 = vmatmul.mubr.bf16.vlgmr.msra.gmra.mxu0 %v1994_v36  ;;  %2334 = vmatmul.mubr.bf16.vlgmr.msra.gmra.mxu1 %v1996_v31 }
 0x298   :  { %2843 = vmatpush3.bf16.msra.mxu0 %v2384_v11  ;;  %2850 = vmatprep.mubr.msk.bf16.mxu0 %vm3197_vm2, %v3194_v8 }
 0x299   :  { %2844 = vmatprep.subr.bf16.mxu0 %v3194_v8 }
 0x29c   :  { %2845 = vmatpush3.bf16.msra.mxu0 %v3165_v2 }
 0x29d   :  { %2846 = vmatprep.subr.bf16.mxu0 %v3194_v8 }
 0x2a0   :  { %2847 = vmatpush3.bf16.msra.mxu0 %v3166_v38 }
 0x2a1   :  { %2848 = vmatprep.subr.bf16.mxu0 %v3194_v8 }
 0x2a4   :  { %2849 = vmatpush3.bf16.msra.mxu0 %v3167_v18 }
 0x357   :  { %v2809_v25 = vpop.f32.mrf.mxu0  ;;  %v2831_v30 = vpop.f32.mrf.mxu1 }
 0x359   :  { %v2810_v23 = vpop.f32.mrf.mxu0  ;;  %v2832_v39 = vpop.f32.mrf.mxu1 }
 0x35a   :  { %v2811_v42 = vadd.f32 %v2810_v23, %v2809_v25  ;;  %v2833_v58 = vadd.f32 %v2832_v39, %v2831_v30 }
 0x35b   :  { %v2812_v45 = vpop.f32.mrf.mxu0  ;;  %v2834_v46 = vpop.f32.mrf.mxu1 }
 0x35c   :  { %v2296_v47 = vadd.f32 %v2811_v42, %v2748_v41 }
 0x35d   :  { %v2813_v48 = vpop.f32.mrf.mxu0  ;;  %v2835_v17 = vpop.f32.mrf.mxu1 }
 0x35e   :  { %v2336_v34 = vadd.f32 %v2833_v58, %v2296_v47 }
 0x360   :  { %v2341_v43 = vmax.f32 %v2336_v34, 0.0 }
 0x362   :  { %v2342_v8 = vpack.c.bf16 %v2341_v43, %v2341_v43 }
 0x364   :  { %2851 = vmatmul.mubr.msk.bf16.vlgmr.msra.gmra.mxu0 %vm2378_vm3, %v2342_v8 }
 0x424   :  { %v2420_v59 = vpop.f32.mrf.mxu0 }
 0x425   :  { %v2421_v52 = vadd.f32 %v2781_v49, %v2420_v59 }
 0x426   :  { %v2852_v29 = vpop.f32.mrf.mxu0 }
 0x427   :  { %v2427_v50 = vsel %vm2426_vm4, %v2421_v52, -inf }
 0x428   :  { %2428 = vmax.xlane.f32.xlu0 %v2427_v50  ;;  %v2423_v27 = vpop.f32.mrf.mxu0 }
 0x42a   :  { %v2853_v44 = vpop.f32.mrf.mxu0 }
 0x4b1   :  { %v2429_v51 = vpop.xlane.xlu0 %2428 }
 0x4b2   :  { %v2430_v54 = vsub.f32 %v2421_v52, %v2429_v51 }
 0x4b4   :  { %v2431_v15 = vmul.f32 1.442695, %v2430_v54 }
 0x4b6   :  { %3168 = vpow2.f32 %v2431_v15 }
 0x4c3   :  { %v3169_v33 = vpop.eup %3168 }
 0x4c4   :  { %v2433_v55 = vsel %vm2426_vm4, %v3169_v33, 0.0 }
 0x4c5   :  { %2434 = vadd.xlane.f32.xlu0 %v2433_v55 }
 0x54e   :  { %v2435_v56 = vpop.xlane.xlu0 %2434 }
 0x54f   :  { %3170 = vlog2.f32 %v2435_v56 }
 0x55c   :  { %v3171_v61 = vpop.eup %3170 }
 0x55d   :  { %v2437_v37 = vmul.f32 0.6931472, %v3171_v61 }
 0x55f   :  { %v2438_v63 = vsub.f32 %v2430_v54, %v2437_v37 }
 0x561   :  { %2439 = vst.msk [vmem:[#allocation2] sm:$0x3] %vm2426_vm4, %v2438_v63 }
 0x562   :  { %3183 = shalt.err (!%p3180_p4)
}
 0x563   :  { %2449 = dma.vmem_to_hbm [thread:$0]  %s2447_s8, 32, %s4101_s9, [#allocation3]  }
 0x564   :  { %3192 = dma.done.wait [#allocation3], 32  }
 0x565   :  { %3193 = vsyncadd [#allocation3], 4294967264 }
 0x566   :  { %2453 = vsyncpa [#allocation3], 1 }

</bundles_post_ra>
